<compile_context>
chip_gen: v7x
topology: tpu7x:2x2x1
jax: 0.10.0
libtpu: 0.0.40
codegen_flags: <defaults>
</compile_context>

<pallas_src>
import jax
import jax.numpy as jnp
from jax import lax
from jax.experimental import pallas as pl

N, H, W, C = 2, 16, 16, 32          # batch, height, width, channels (NCHW I/O)
KH = KW = 3                          # conv kernel (odd, 'same' padding)
NEG_SLOPE = 0.01                     # nn.LeakyReLU default slope
BN_EPS = 1e-5                        # nn.BatchNorm2d default eps
NHW = N * H * W                      # 512 pixels -> lane axis (lane dense)
K_IM2COL = KH * KW * C               # 288

assert H & (H - 1) == 0 and W & (W - 1) == 0, "bit tricks assume pow2 H, W"
LOG2_W = W.bit_length() - 1


def _leaky(x):
    return jnp.where(x > 0, x, NEG_SLOPE * x)


def residual_block_kernel(
    x_ref,                       # (C, NHW) f32, channels-major lane-dense
    g1_ref, b1_ref, w1_ref,      # BN1 gamma/beta (C,1) f32; conv1 (C, 9C) bf16
    g2_ref, b2_ref,              # BN2 gamma/beta (C,1) f32
    w2g_ref, b2g_ref,            # conv2 (+) folded gate: (2C, 9C) bf16, (2C,1) f32
    o_ref,                       # (C, NHW) f32
):
    inv_n = 1.0 / NHW

    # --- static per-tap shift distances + validity masks (shared by both convs)
    # pixel p = n*H*W + row*W + col ; masks implement the conv's zero padding.
    pix = lax.broadcasted_iota(jnp.int32, (C, NHW), 1)
    col = jnp.bitwise_and(pix, W - 1)                              # p % W
    row = jnp.bitwise_and(jnp.right_shift(pix, LOG2_W), H - 1)     # (p // W) % H
    taps_spec = []
    for dh in (-1, 0, 1):
        for dw in (-1, 0, 1):
            conds = []
            if dh < 0:
                conds.append(row >= -dh)
            if dh > 0:
                conds.append(row < H - dh)
            if dw < 0:
                conds.append(col >= -dw)
            if dw > 0:
                conds.append(col < W - dw)
            valid = None
            for cnd in conds:
                valid = cnd if valid is None else valid & cnd
            taps_spec.append((dh * W + dw, valid))

    def bn_leaky(h, gamma, beta):
        # Training-mode BatchNorm2d (batch stats, biased variance), centered
        # two-pass for numerical robustness, fused with LeakyReLU.
        mean = jnp.sum(h, axis=1, keepdims=True) * inv_n
        hc = h - mean
        var = jnp.sum(hc * hc, axis=1, keepdims=True) * inv_n
        return _leaky(hc * (gamma * lax.rsqrt(var + BN_EPS)) + beta)

    def shift_pixels(a, d):
        # Lane rotation: b[:, p] = a[:, (p + d) % NHW].  Wrap-around lanes are
        # exactly the ones zeroed by the tap's boundary mask.
        k = d % NHW
        return jnp.concatenate([a[:, k:], a[:, :k]], axis=1)

    def conv3x3(h, w_ref):
        # 'same' 3x3 conv as ONE bf16 MXU matmul (Cout, 9C) @ (9C, NHW).
        hb = h.astype(jnp.bfloat16)            # single (C, NHW) f32->bf16 cast
        taps = []
        for d, valid in taps_spec:
            t = hb if d == 0 else shift_pixels(hb, d)
            if valid is not None:
                t = jnp.where(valid, t, jnp.zeros_like(t))   # bit-select, no bf16 math
            taps.append(t)
        patches = jnp.concatenate(taps, axis=0)              # (9C, NHW) bf16
        return jnp.dot(w_ref[...], patches,
                       preferred_element_type=jnp.float32)   # (Cout, NHW) f32

    # --- f(x): block_type 'bacdbac' with dropout=None -> 2 x [BN, act, conv] ---
    # conv1 bias is omitted: it cancels exactly inside training-mode BN2.
    h = conv3x3(bn_leaky(x_ref[...], g1_ref[...], b1_ref[...]), w1_ref)
    h = bn_leaky(h, g2_ref[...], b2_ref[...])

    # conv2 with the GateLayer2d 1x1 folded in -> ag = (2C, NHW).
    ag = conv3x3(h, w2g_ref) + b2g_ref[...]
    gated = _leaky(ag[:C, :]) * jax.nn.sigmoid(ag[C:, :])

    # --- residual add (re-read x late to keep its live range short) ---
    o_ref[...] = (gated + x_ref[...]).astype(o_ref.dtype)


@jax.jit
def residual_block_pallas(x, p):
    # NCHW -> channels-major lane-dense slab (C, N*H*W) (layout plumbing only).
    x_cn = jnp.transpose(x, (1, 0, 2, 3)).reshape(C, NHW)
    # HWIO conv weights -> (Cout, 9*Cin), column order (kh, kw, ci) = tap order.
    w1f = jnp.transpose(p["w1"], (3, 0, 1, 2)).reshape(C, K_IM2COL).astype(jnp.bfloat16)
    w2f = jnp.transpose(p["w2"], (3, 0, 1, 2)).reshape(C, K_IM2COL)
    # Fold the GateLayer2d 1x1 conv (C -> 2C) into conv2 (exact composition):
    #   ag = Wg @ (W2 * P + cb2) + bg = (Wg @ W2) * P + (Wg @ cb2 + bg)
    w2g = (p["wg"] @ w2f).astype(jnp.bfloat16)                           # (2C, 9C)
    b2g = p["wg"] @ p["cb2"].reshape(C, 1) + p["bg"].reshape(2 * C, 1)   # (2C, 1)
    # conv1 bias (cb1) intentionally not passed: cancels in training-mode BN2.
    out_cn = pl.pallas_call(
        residual_block_kernel,
        out_shape=jax.ShapeDtypeStruct((C, NHW), jnp.float32),
        cost_estimate=pl.CostEstimate(
            flops=30_000_000, transcendentals=17_000, bytes_accessed=190_000),
    )(
        x_cn,
        p["g1"].reshape(C, 1), p["b1"].reshape(C, 1), w1f,
        p["g2"].reshape(C, 1), p["b2"].reshape(C, 1),
        w2g, b2g,
    )
    return jnp.transpose(out_cn.reshape(C, N, H, W), (1, 0, 2, 3))


def init_params(key):
    ks = jax.random.split(key, 10)
    nrm = jax.random.normal
    return dict(
        g1=1.0 + 0.1 * nrm(ks[0], (C,), jnp.float32),
        b1=0.1 * nrm(ks[1], (C,), jnp.float32),
        w1=0.1 * nrm(ks[2], (KH, KW, C, C), jnp.float32),      # HWIO
        cb1=0.05 * nrm(ks[3], (C,), jnp.float32),
        g2=1.0 + 0.1 * nrm(ks[4], (C,), jnp.float32),
        b2=0.1 * nrm(ks[5], (C,), jnp.float32),
        w2=0.1 * nrm(ks[6], (KH, KW, C, C), jnp.float32),      # HWIO
        cb2=0.05 * nrm(ks[7], (C,), jnp.float32),
        wg=0.1 * nrm(ks[8], (2 * C, C), jnp.float32),          # GateLayer2d 1x1, C->2C
        bg=0.05 * nrm(ks[9], (2 * C,), jnp.float32),
    )


def residual_block_ref(x, p):
    """Pure-JAX f32 reference (XLA convs, NCHW) for correctness checking."""
    def bn(h, g, b):
        mean = jnp.mean(h, axis=(0, 2, 3), keepdims=True)
        var = jnp.mean((h - mean) ** 2, axis=(0, 2, 3), keepdims=True)
        return ((h - mean) * lax.rsqrt(var + BN_EPS)
                * g.reshape(1, C, 1, 1) + b.reshape(1, C, 1, 1))

    def conv(h, w, b):
        out = lax.conv_general_dilated(
            h, w, (1, 1), "SAME",
            dimension_numbers=("NCHW", "HWIO", "NCHW"))
        return out + b.reshape(1, C, 1, 1)

    h = conv(_leaky(bn(x, p["g1"], p["b1"])), p["w1"], p["cb1"])
    h = conv(_leaky(bn(h, p["g2"], p["b2"])), p["w2"], p["cb2"])
    ag = jnp.einsum("nchw,oc->nohw", h, p["wg"]) + p["bg"].reshape(1, 2 * C, 1, 1)
    return _leaky(ag[:, :C]) * jax.nn.sigmoid(ag[:, C:]) + x


if __name__ == "__main__":
    key = jax.random.PRNGKey(0)
    kx, kp = jax.random.split(key)
    x = jax.random.normal(kx, (N, C, H, W), jnp.float32)
    params = init_params(kp)

    out = jax.block_until_ready(residual_block_pallas(x, params))
    ref = jax.block_until_ready(residual_block_ref(x, params))

    assert out.shape == (N, C, H, W)
    # bf16 MXU operands (f32 accumulation) vs a pure-f32 reference: relaxed
    # tolerance; real bugs (layout / shift / mask errors) produce O(0.1+) errors.
    if not bool(jnp.allclose(out, ref, rtol=3e-2, atol=3e-2)):
        max_err = float(jnp.max(jnp.abs(out - ref)))
        raise AssertionError(f"mismatch vs JAX reference, max abs err={max_err}")

    print("KERNEL_OK")
</pallas_src>

<mosaic_0001>
module attributes {stable_mosaic.version = 11 : i64} {
  func.func @residual_block_kernel(%arg0: memref<32x512xf32, #tpu.memory_space<vmem>>, %arg1: memref<32x1xf32, #tpu.memory_space<vmem>>, %arg2: memref<32x1xf32, #tpu.memory_space<vmem>>, %arg3: memref<32x288xbf16, #tpu.memory_space<vmem>>, %arg4: memref<32x1xf32, #tpu.memory_space<vmem>>, %arg5: memref<32x1xf32, #tpu.memory_space<vmem>>, %arg6: memref<64x288xbf16, #tpu.memory_space<vmem>>, %arg7: memref<64x1xf32, #tpu.memory_space<vmem>>, %arg8: memref<32x512xf32, #tpu.memory_space<vmem>>) attributes {dimension_semantics = [], scalar_prefetch = 0 : i64, scratch_operands = 0 : i64, tpu.core_type = #tpu.core_type<tc>} {
    %0 = tpu.iota {dimensions = array<i32: 1>} : vector<32x512xi32>
    %c15_i32 = arith.constant 15 : i32
    %1 = vector.broadcast %c15_i32 : i32 to vector<32x512xi32>
    %2 = arith.andi %0, %1 : vector<32x512xi32>
    %c4_i32 = arith.constant 4 : i32
    %3 = vector.broadcast %c4_i32 : i32 to vector<32x512xi32>
    %4 = arith.shrsi %0, %3 : vector<32x512xi32>
    %c15_i32_0 = arith.constant 15 : i32
    %5 = vector.broadcast %c15_i32_0 : i32 to vector<32x512xi32>
    %6 = arith.andi %4, %5 : vector<32x512xi32>
    %c1_i32 = arith.constant 1 : i32
    %7 = vector.broadcast %c1_i32 : i32 to vector<32x512xi32>
    %8 = arith.cmpi sge, %6, %7 : vector<32x512xi32>
    %c1_i32_1 = arith.constant 1 : i32
    %9 = vector.broadcast %c1_i32_1 : i32 to vector<32x512xi32>
    %10 = arith.cmpi sge, %2, %9 : vector<32x512xi32>
    %11 = arith.andi %8, %10 : vector<32x512xi1>
    %c1_i32_2 = arith.constant 1 : i32
    %12 = vector.broadcast %c1_i32_2 : i32 to vector<32x512xi32>
    %13 = arith.cmpi sge, %6, %12 : vector<32x512xi32>
    %c1_i32_3 = arith.constant 1 : i32
    %14 = vector.broadcast %c1_i32_3 : i32 to vector<32x512xi32>
    %15 = arith.cmpi sge, %6, %14 : vector<32x512xi32>
    %c15_i32_4 = arith.constant 15 : i32
    %16 = vector.broadcast %c15_i32_4 : i32 to vector<32x512xi32>
    %17 = arith.cmpi slt, %2, %16 : vector<32x512xi32>
    %18 = arith.andi %15, %17 : vector<32x512xi1>
    %c1_i32_5 = arith.constant 1 : i32
    %19 = vector.broadcast %c1_i32_5 : i32 to vector<32x512xi32>
    %20 = arith.cmpi sge, %2, %19 : vector<32x512xi32>
    %c15_i32_6 = arith.constant 15 : i32
    %21 = vector.broadcast %c15_i32_6 : i32 to vector<32x512xi32>
    %22 = arith.cmpi slt, %2, %21 : vector<32x512xi32>
    %c15_i32_7 = arith.constant 15 : i32
    %23 = vector.broadcast %c15_i32_7 : i32 to vector<32x512xi32>
    %24 = arith.cmpi slt, %6, %23 : vector<32x512xi32>
    %c1_i32_8 = arith.constant 1 : i32
    %25 = vector.broadcast %c1_i32_8 : i32 to vector<32x512xi32>
    %26 = arith.cmpi sge, %2, %25 : vector<32x512xi32>
    %27 = arith.andi %24, %26 : vector<32x512xi1>
    %c15_i32_9 = arith.constant 15 : i32
    %28 = vector.broadcast %c15_i32_9 : i32 to vector<32x512xi32>
    %29 = arith.cmpi slt, %6, %28 : vector<32x512xi32>
    %c15_i32_10 = arith.constant 15 : i32
    %30 = vector.broadcast %c15_i32_10 : i32 to vector<32x512xi32>
    %31 = arith.cmpi slt, %6, %30 : vector<32x512xi32>
    %c15_i32_11 = arith.constant 15 : i32
    %32 = vector.broadcast %c15_i32_11 : i32 to vector<32x512xi32>
    %33 = arith.cmpi slt, %2, %32 : vector<32x512xi32>
    %34 = arith.andi %31, %33 : vector<32x512xi1>
    %c0 = arith.constant 0 : index
    %c0_12 = arith.constant 0 : index
    %35 = vector.load %arg0[%c0, %c0_12] : memref<32x512xf32, #tpu.memory_space<vmem>>, vector<32x512xf32>
    %c0_13 = arith.constant 0 : index
    %c0_14 = arith.constant 0 : index
    %36 = vector.load %arg1[%c0_13, %c0_14] : memref<32x1xf32, #tpu.memory_space<vmem>>, vector<32x1xf32>
    %c0_15 = arith.constant 0 : index
    %c0_16 = arith.constant 0 : index
    %37 = vector.load %arg2[%c0_15, %c0_16] : memref<32x1xf32, #tpu.memory_space<vmem>>, vector<32x1xf32>
    %cst = arith.constant dense<0.000000e+00> : vector<32xf32>
    %38 = vector.multi_reduction <add>, %35, %cst [1] : vector<32x512xf32> to vector<32xf32>
    %39 = vector.shape_cast %38 : vector<32xf32> to vector<32x1xf32>
    %cst_17 = arith.constant 0.001953125 : f32
    %40 = vector.broadcast %cst_17 : f32 to vector<32x1xf32>
    %41 = arith.mulf %39, %40 : vector<32x1xf32>
    %42 = vector.broadcast %41 : vector<32x1xf32> to vector<32x512xf32>
    %43 = arith.subf %35, %42 : vector<32x512xf32>
    %44 = arith.mulf %43, %43 : vector<32x512xf32>
    %cst_18 = arith.constant dense<0.000000e+00> : vector<32xf32>
    %45 = vector.multi_reduction <add>, %44, %cst_18 [1] : vector<32x512xf32> to vector<32xf32>
    %46 = vector.shape_cast %45 : vector<32xf32> to vector<32x1xf32>
    %cst_19 = arith.constant 0.001953125 : f32
    %47 = vector.broadcast %cst_19 : f32 to vector<32x1xf32>
    %48 = arith.mulf %46, %47 : vector<32x1xf32>
    %cst_20 = arith.constant 9.99999974E-6 : f32
    %49 = vector.broadcast %cst_20 : f32 to vector<32x1xf32>
    %50 = arith.addf %48, %49 : vector<32x1xf32>
    %51 = math.rsqrt %50 : vector<32x1xf32>
    %52 = arith.mulf %36, %51 : vector<32x1xf32>
    %53 = vector.broadcast %52 : vector<32x1xf32> to vector<32x512xf32>
    %54 = arith.mulf %43, %53 : vector<32x512xf32>
    %55 = vector.broadcast %37 : vector<32x1xf32> to vector<32x512xf32>
    %56 = arith.addf %54, %55 : vector<32x512xf32>
    %cst_21 = arith.constant 0.000000e+00 : f32
    %57 = vector.broadcast %cst_21 : f32 to vector<32x512xf32>
    %58 = arith.cmpf ogt, %56, %57 : vector<32x512xf32>
    %cst_22 = arith.constant 0.00999999977 : f32
    %59 = vector.broadcast %cst_22 : f32 to vector<32x512xf32>
    %60 = arith.mulf %59, %56 : vector<32x512xf32>
    %61 = arith.select %58, %56, %60 : vector<32x512xi1>, vector<32x512xf32>
    %62 = arith.truncf %61 : vector<32x512xf32> to vector<32x512xbf16>
    %63 = vector.extract_strided_slice %62 {offsets = [0, 495], sizes = [32, 17], strides = [1, 1]} : vector<32x512xbf16> to vector<32x17xbf16>
    %64 = vector.extract_strided_slice %62 {offsets = [0, 0], sizes = [32, 495], strides = [1, 1]} : vector<32x512xbf16> to vector<32x495xbf16>
    %65 = tpu.concatenate %63, %64 in 1 : vector<32x17xbf16>, vector<32x495xbf16> -> vector<32x512xbf16>
    %cst_23 = arith.constant 0.000000e+00 : bf16
    %66 = vector.broadcast %cst_23 : bf16 to vector<32x512xbf16>
    %67 = arith.select %11, %65, %66 : vector<32x512xi1>, vector<32x512xbf16>
    %68 = vector.extract_strided_slice %62 {offsets = [0, 496], sizes = [32, 16], strides = [1, 1]} : vector<32x512xbf16> to vector<32x16xbf16>
    %69 = vector.extract_strided_slice %62 {offsets = [0, 0], sizes = [32, 496], strides = [1, 1]} : vector<32x512xbf16> to vector<32x496xbf16>
    %70 = tpu.concatenate %68, %69 in 1 : vector<32x16xbf16>, vector<32x496xbf16> -> vector<32x512xbf16>
    %cst_24 = arith.constant 0.000000e+00 : bf16
    %71 = vector.broadcast %cst_24 : bf16 to vector<32x512xbf16>
    %72 = arith.select %13, %70, %71 : vector<32x512xi1>, vector<32x512xbf16>
    %73 = vector.extract_strided_slice %62 {offsets = [0, 497], sizes = [32, 15], strides = [1, 1]} : vector<32x512xbf16> to vector<32x15xbf16>
    %74 = vector.extract_strided_slice %62 {offsets = [0, 0], sizes = [32, 497], strides = [1, 1]} : vector<32x512xbf16> to vector<32x497xbf16>
    %75 = tpu.concatenate %73, %74 in 1 : vector<32x15xbf16>, vector<32x497xbf16> -> vector<32x512xbf16>
    %cst_25 = arith.constant 0.000000e+00 : bf16
    %76 = vector.broadcast %cst_25 : bf16 to vector<32x512xbf16>
    %77 = arith.select %18, %75, %76 : vector<32x512xi1>, vector<32x512xbf16>
    %78 = vector.extract_strided_slice %62 {offsets = [0, 511], sizes = [32, 1], strides = [1, 1]} : vector<32x512xbf16> to vector<32x1xbf16>
    %79 = vector.extract_strided_slice %62 {offsets = [0, 0], sizes = [32, 511], strides = [1, 1]} : vector<32x512xbf16> to vector<32x511xbf16>
    %80 = tpu.concatenate %78, %79 in 1 : vector<32x1xbf16>, vector<32x511xbf16> -> vector<32x512xbf16>
    %cst_26 = arith.constant 0.000000e+00 : bf16
    %81 = vector.broadcast %cst_26 : bf16 to vector<32x512xbf16>
    %82 = arith.select %20, %80, %81 : vector<32x512xi1>, vector<32x512xbf16>
    %83 = vector.extract_strided_slice %62 {offsets = [0, 1], sizes = [32, 511], strides = [1, 1]} : vector<32x512xbf16> to vector<32x511xbf16>
    %84 = vector.extract_strided_slice %62 {offsets = [0, 0], sizes = [32, 1], strides = [1, 1]} : vector<32x512xbf16> to vector<32x1xbf16>
    %85 = tpu.concatenate %83, %84 in 1 : vector<32x511xbf16>, vector<32x1xbf16> -> vector<32x512xbf16>
    %cst_27 = arith.constant 0.000000e+00 : bf16
    %86 = vector.broadcast %cst_27 : bf16 to vector<32x512xbf16>
    %87 = arith.select %22, %85, %86 : vector<32x512xi1>, vector<32x512xbf16>
    %88 = vector.extract_strided_slice %62 {offsets = [0, 15], sizes = [32, 497], strides = [1, 1]} : vector<32x512xbf16> to vector<32x497xbf16>
    %89 = vector.extract_strided_slice %62 {offsets = [0, 0], sizes = [32, 15], strides = [1, 1]} : vector<32x512xbf16> to vector<32x15xbf16>
    %90 = tpu.concatenate %88, %89 in 1 : vector<32x497xbf16>, vector<32x15xbf16> -> vector<32x512xbf16>
    %cst_28 = arith.constant 0.000000e+00 : bf16
    %91 = vector.broadcast %cst_28 : bf16 to vector<32x512xbf16>
    %92 = arith.select %27, %90, %91 : vector<32x512xi1>, vector<32x512xbf16>
    %93 = vector.extract_strided_slice %62 {offsets = [0, 16], sizes = [32, 496], strides = [1, 1]} : vector<32x512xbf16> to vector<32x496xbf16>
    %94 = vector.extract_strided_slice %62 {offsets = [0, 0], sizes = [32, 16], strides = [1, 1]} : vector<32x512xbf16> to vector<32x16xbf16>
    %95 = tpu.concatenate %93, %94 in 1 : vector<32x496xbf16>, vector<32x16xbf16> -> vector<32x512xbf16>
    %cst_29 = arith.constant 0.000000e+00 : bf16
    %96 = vector.broadcast %cst_29 : bf16 to vector<32x512xbf16>
    %97 = arith.select %29, %95, %96 : vector<32x512xi1>, vector<32x512xbf16>
    %98 = vector.extract_strided_slice %62 {offsets = [0, 17], sizes = [32, 495], strides = [1, 1]} : vector<32x512xbf16> to vector<32x495xbf16>
    %99 = vector.extract_strided_slice %62 {offsets = [0, 0], sizes = [32, 17], strides = [1, 1]} : vector<32x512xbf16> to vector<32x17xbf16>
    %100 = tpu.concatenate %98, %99 in 1 : vector<32x495xbf16>, vector<32x17xbf16> -> vector<32x512xbf16>
    %cst_30 = arith.constant 0.000000e+00 : bf16
    %101 = vector.broadcast %cst_30 : bf16 to vector<32x512xbf16>
    %102 = arith.select %34, %100, %101 : vector<32x512xi1>, vector<32x512xbf16>
    %103 = tpu.concatenate %67, %72, %77, %82, %62, %87, %92, %97, %102 in 0 : vector<32x512xbf16>, vector<32x512xbf16>, vector<32x512xbf16>, vector<32x512xbf16>, vector<32x512xbf16>, vector<32x512xbf16>, vector<32x512xbf16>, vector<32x512xbf16>, vector<32x512xbf16> -> vector<288x512xbf16>
    %c0_31 = arith.constant 0 : index
    %c0_32 = arith.constant 0 : index
    %104 = vector.load %arg3[%c0_31, %c0_32] : memref<32x288xbf16, #tpu.memory_space<vmem>>, vector<32x288xbf16>
    %cst_33 = arith.constant dense<0.000000e+00> : vector<32x512xf32>
    %105 = tpu.matmul %104, %103, %cst_33 {dimension_numbers = #tpu.dot_dimension_numbers<[1], [0], [0], [1], [0, 0, 1, 1], [], []>} : vector<32x288xbf16>, vector<288x512xbf16>, vector<32x512xf32> -> vector<32x512xf32>
    %c0_34 = arith.constant 0 : index
    %c0_35 = arith.constant 0 : index
    %106 = vector.load %arg4[%c0_34, %c0_35] : memref<32x1xf32, #tpu.memory_space<vmem>>, vector<32x1xf32>
    %c0_36 = arith.constant 0 : index
    %c0_37 = arith.constant 0 : index
    %107 = vector.load %arg5[%c0_36, %c0_37] : memref<32x1xf32, #tpu.memory_space<vmem>>, vector<32x1xf32>
    %cst_38 = arith.constant dense<0.000000e+00> : vector<32xf32>
    %108 = vector.multi_reduction <add>, %105, %cst_38 [1] : vector<32x512xf32> to vector<32xf32>
    %109 = vector.shape_cast %108 : vector<32xf32> to vector<32x1xf32>
    %cst_39 = arith.constant 0.001953125 : f32
    %110 = vector.broadcast %cst_39 : f32 to vector<32x1xf32>
    %111 = arith.mulf %109, %110 : vector<32x1xf32>
    %112 = vector.broadcast %111 : vector<32x1xf32> to vector<32x512xf32>
    %113 = arith.subf %105, %112 : vector<32x512xf32>
    %114 = arith.mulf %113, %113 : vector<32x512xf32>
    %cst_40 = arith.constant dense<0.000000e+00> : vector<32xf32>
    %115 = vector.multi_reduction <add>, %114, %cst_40 [1] : vector<32x512xf32> to vector<32xf32>
    %116 = vector.shape_cast %115 : vector<32xf32> to vector<32x1xf32>
    %cst_41 = arith.constant 0.001953125 : f32
    %117 = vector.broadcast %cst_41 : f32 to vector<32x1xf32>
    %118 = arith.mulf %116, %117 : vector<32x1xf32>
    %cst_42 = arith.constant 9.99999974E-6 : f32
    %119 = vector.broadcast %cst_42 : f32 to vector<32x1xf32>
    %120 = arith.addf %118, %119 : vector<32x1xf32>
    %121 = math.rsqrt %120 : vector<32x1xf32>
    %122 = arith.mulf %106, %121 : vector<32x1xf32>
    %123 = vector.broadcast %122 : vector<32x1xf32> to vector<32x512xf32>
    %124 = arith.mulf %113, %123 : vector<32x512xf32>
    %125 = vector.broadcast %107 : vector<32x1xf32> to vector<32x512xf32>
    %126 = arith.addf %124, %125 : vector<32x512xf32>
    %cst_43 = arith.constant 0.000000e+00 : f32
    %127 = vector.broadcast %cst_43 : f32 to vector<32x512xf32>
    %128 = arith.cmpf ogt, %126, %127 : vector<32x512xf32>
    %cst_44 = arith.constant 0.00999999977 : f32
    %129 = vector.broadcast %cst_44 : f32 to vector<32x512xf32>
    %130 = arith.mulf %129, %126 : vector<32x512xf32>
    %131 = arith.select %128, %126, %130 : vector<32x512xi1>, vector<32x512xf32>
    %132 = arith.truncf %131 : vector<32x512xf32> to vector<32x512xbf16>
    %133 = vector.extract_strided_slice %132 {offsets = [0, 495], sizes = [32, 17], strides = [1, 1]} : vector<32x512xbf16> to vector<32x17xbf16>
    %134 = vector.extract_strided_slice %132 {offsets = [0, 0], sizes = [32, 495], strides = [1, 1]} : vector<32x512xbf16> to vector<32x495xbf16>
    %135 = tpu.concatenate %133, %134 in 1 : vector<32x17xbf16>, vector<32x495xbf16> -> vector<32x512xbf16>
    %cst_45 = arith.constant 0.000000e+00 : bf16
    %136 = vector.broadcast %cst_45 : bf16 to vector<32x512xbf16>
    %137 = arith.select %11, %135, %136 : vector<32x512xi1>, vector<32x512xbf16>
    %138 = vector.extract_strided_slice %132 {offsets = [0, 496], sizes = [32, 16], strides = [1, 1]} : vector<32x512xbf16> to vector<32x16xbf16>
    %139 = vector.extract_strided_slice %132 {offsets = [0, 0], sizes = [32, 496], strides = [1, 1]} : vector<32x512xbf16> to vector<32x496xbf16>
    %140 = tpu.concatenate %138, %139 in 1 : vector<32x16xbf16>, vector<32x496xbf16> -> vector<32x512xbf16>
    %cst_46 = arith.constant 0.000000e+00 : bf16
    %141 = vector.broadcast %cst_46 : bf16 to vector<32x512xbf16>
    %142 = arith.select %13, %140, %141 : vector<32x512xi1>, vector<32x512xbf16>
    %143 = vector.extract_strided_slice %132 {offsets = [0, 497], sizes = [32, 15], strides = [1, 1]} : vector<32x512xbf16> to vector<32x15xbf16>
    %144 = vector.extract_strided_slice %132 {offsets = [0, 0], sizes = [32, 497], strides = [1, 1]} : vector<32x512xbf16> to vector<32x497xbf16>
    %145 = tpu.concatenate %143, %144 in 1 : vector<32x15xbf16>, vector<32x497xbf16> -> vector<32x512xbf16>
    %cst_47 = arith.constant 0.000000e+00 : bf16
    %146 = vector.broadcast %cst_47 : bf16 to vector<32x512xbf16>
    %147 = arith.select %18, %145, %146 : vector<32x512xi1>, vector<32x512xbf16>
    %148 = vector.extract_strided_slice %132 {offsets = [0, 511], sizes = [32, 1], strides = [1, 1]} : vector<32x512xbf16> to vector<32x1xbf16>
    %149 = vector.extract_strided_slice %132 {offsets = [0, 0], sizes = [32, 511], strides = [1, 1]} : vector<32x512xbf16> to vector<32x511xbf16>
    %150 = tpu.concatenate %148, %149 in 1 : vector<32x1xbf16>, vector<32x511xbf16> -> vector<32x512xbf16>
    %cst_48 = arith.constant 0.000000e+00 : bf16
    %151 = vector.broadcast %cst_48 : bf16 to vector<32x512xbf16>
    %152 = arith.select %20, %150, %151 : vector<32x512xi1>, vector<32x512xbf16>
    %153 = vector.extract_strided_slice %132 {offsets = [0, 1], sizes = [32, 511], strides = [1, 1]} : vector<32x512xbf16> to vector<32x511xbf16>
    %154 = vector.extract_strided_slice %132 {offsets = [0, 0], sizes = [32, 1], strides = [1, 1]} : vector<32x512xbf16> to vector<32x1xbf16>
    %155 = tpu.concatenate %153, %154 in 1 : vector<32x511xbf16>, vector<32x1xbf16> -> vector<32x512xbf16>
    %cst_49 = arith.constant 0.000000e+00 : bf16
    %156 = vector.broadcast %cst_49 : bf16 to vector<32x512xbf16>
    %157 = arith.select %22, %155, %156 : vector<32x512xi1>, vector<32x512xbf16>
    %158 = vector.extract_strided_slice %132 {offsets = [0, 15], sizes = [32, 497], strides = [1, 1]} : vector<32x512xbf16> to vector<32x497xbf16>
    %159 = vector.extract_strided_slice %132 {offsets = [0, 0], sizes = [32, 15], strides = [1, 1]} : vector<32x512xbf16> to vector<32x15xbf16>
    %160 = tpu.concatenate %158, %159 in 1 : vector<32x497xbf16>, vector<32x15xbf16> -> vector<32x512xbf16>
    %cst_50 = arith.constant 0.000000e+00 : bf16
    %161 = vector.broadcast %cst_50 : bf16 to vector<32x512xbf16>
    %162 = arith.select %27, %160, %161 : vector<32x512xi1>, vector<32x512xbf16>
    %163 = vector.extract_strided_slice %132 {offsets = [0, 16], sizes = [32, 496], strides = [1, 1]} : vector<32x512xbf16> to vector<32x496xbf16>
    %164 = vector.extract_strided_slice %132 {offsets = [0, 0], sizes = [32, 16], strides = [1, 1]} : vector<32x512xbf16> to vector<32x16xbf16>
    %165 = tpu.concatenate %163, %164 in 1 : vector<32x496xbf16>, vector<32x16xbf16> -> vector<32x512xbf16>
    %cst_51 = arith.constant 0.000000e+00 : bf16
    %166 = vector.broadcast %cst_51 : bf16 to vector<32x512xbf16>
    %167 = arith.select %29, %165, %166 : vector<32x512xi1>, vector<32x512xbf16>
    %168 = vector.extract_strided_slice %132 {offsets = [0, 17], sizes = [32, 495], strides = [1, 1]} : vector<32x512xbf16> to vector<32x495xbf16>
    %169 = vector.extract_strided_slice %132 {offsets = [0, 0], sizes = [32, 17], strides = [1, 1]} : vector<32x512xbf16> to vector<32x17xbf16>
    %170 = tpu.concatenate %168, %169 in 1 : vector<32x495xbf16>, vector<32x17xbf16> -> vector<32x512xbf16>
    %cst_52 = arith.constant 0.000000e+00 : bf16
    %171 = vector.broadcast %cst_52 : bf16 to vector<32x512xbf16>
    %172 = arith.select %34, %170, %171 : vector<32x512xi1>, vector<32x512xbf16>
    %173 = tpu.concatenate %137, %142, %147, %152, %132, %157, %162, %167, %172 in 0 : vector<32x512xbf16>, vector<32x512xbf16>, vector<32x512xbf16>, vector<32x512xbf16>, vector<32x512xbf16>, vector<32x512xbf16>, vector<32x512xbf16>, vector<32x512xbf16>, vector<32x512xbf16> -> vector<288x512xbf16>
    %c0_53 = arith.constant 0 : index
    %c0_54 = arith.constant 0 : index
    %174 = vector.load %arg6[%c0_53, %c0_54] : memref<64x288xbf16, #tpu.memory_space<vmem>>, vector<64x288xbf16>
    %cst_55 = arith.constant dense<0.000000e+00> : vector<64x512xf32>
    %175 = tpu.matmul %174, %173, %cst_55 {dimension_numbers = #tpu.dot_dimension_numbers<[1], [0], [0], [1], [0, 0, 1, 1], [], []>} : vector<64x288xbf16>, vector<288x512xbf16>, vector<64x512xf32> -> vector<64x512xf32>
    %c0_56 = arith.constant 0 : index
    %c0_57 = arith.constant 0 : index
    %176 = vector.load %arg7[%c0_56, %c0_57] : memref<64x1xf32, #tpu.memory_space<vmem>>, vector<64x1xf32>
    %177 = vector.broadcast %176 : vector<64x1xf32> to vector<64x512xf32>
    %178 = arith.addf %175, %177 : vector<64x512xf32>
    %179 = vector.extract_strided_slice %178 {offsets = [0, 0], sizes = [32, 512], strides = [1, 1]} : vector<64x512xf32> to vector<32x512xf32>
    %cst_58 = arith.constant 0.000000e+00 : f32
    %180 = vector.broadcast %cst_58 : f32 to vector<32x512xf32>
    %181 = arith.cmpf ogt, %179, %180 : vector<32x512xf32>
    %cst_59 = arith.constant 0.00999999977 : f32
    %182 = vector.broadcast %cst_59 : f32 to vector<32x512xf32>
    %183 = arith.mulf %182, %179 : vector<32x512xf32>
    %184 = arith.select %181, %179, %183 : vector<32x512xi1>, vector<32x512xf32>
    %185 = vector.extract_strided_slice %178 {offsets = [32, 0], sizes = [32, 512], strides = [1, 1]} : vector<64x512xf32> to vector<32x512xf32>
    %186 = arith.negf %185 : vector<32x512xf32>
    %187 = math.exp %186 : vector<32x512xf32>
    %cst_60 = arith.constant 1.000000e+00 : f32
    %188 = vector.broadcast %cst_60 : f32 to vector<32x512xf32>
    %189 = arith.addf %188, %187 : vector<32x512xf32>
    %190 = arith.divf %188, %189 : vector<32x512xf32>
    %191 = arith.mulf %184, %190 : vector<32x512xf32>
    %c0_61 = arith.constant 0 : index
    %c0_62 = arith.constant 0 : index
    %192 = vector.load %arg0[%c0_61, %c0_62] : memref<32x512xf32, #tpu.memory_space<vmem>>, vector<32x512xf32>
    %193 = arith.addf %191, %192 : vector<32x512xf32>
    %c0_63 = arith.constant 0 : index
    %c0_64 = arith.constant 0 : index
    %194 = vector.load %arg8[%c0_63, %c0_64] : memref<32x512xf32, #tpu.memory_space<vmem>>, vector<32x512xf32>
    tpu.vector_store %arg8[%c0_63, %c0_64], %193 {strides = array<i32>} : memref<32x512xf32, #tpu.memory_space<vmem>>, vector<32x512xf32>,
    return
  }
}

</mosaic_0001>

<bundles_post_ra>
// kernel: residual_block_pallas.1
= control target key start
LH: loop header
LB: loop body
LE: loop exit
PB: predicated region body
PF: predicated region fallthrough
CT: control target
= control target key end

     0   :  { %s2686_s9 = smov 15   ;;  %s2687_s10 = smov 1   ;;  %s4473_s0 = inlined_call_operand.vmem [shape: f32[32,512], index: 0, kind: input, shape index: {}]   ;;  %s4474_s2 = inlined_call_operand.vmem [shape: f32[32,1], index: 2, kind: input, shape index: {}]   ;;  %s4475_s1 = inlined_call_operand.vmem [shape: f32[32,1], index: 1, kind: input, shape index: {}]   ;;  %s4476_s3 = inlined_call_operand.vmem [shape: bf16[32,288], index: 3, kind: input, shape index: {}]   ;;  %s4477_s5 = inlined_call_operand.vmem [shape: f32[32,1], index: 5, kind: input, shape index: {}]   ;;  %s4478_s4 = inlined_call_operand.vmem [shape: f32[32,1], index: 4, kind: input, shape index: {}]   ;;  %s4479_s6 = inlined_call_operand.vmem [shape: bf16[64,288], index: 6, kind: input, shape index: {}]   ;;  %s4480_s7 = inlined_call_operand.vmem [shape: f32[64,1], index: 7, kind: input, shape index: {}]   ;;  %s4481_s8 = inlined_call_operand.vmem [shape: f32[32,512], index: 8, kind: output, shape index: {}]  }
   0x1   :  { %v81_v0 = vld [vmem:[%s4473_s0] sm:$0xff]  ;;  %v82_v1 = vld [vmem:[%s4473_s0 + $0x8] sm:$0xff]  ;;  %v83_v2 = vld [vmem:[%s4473_s0 + $0x10] sm:$0xff]  ;;  %s2688_s11 = smov 127   ;;  %s2689_s12 = smov 113  }
   0x2   :  { %v105_v3 = vadd.f32 %v82_v1, %v81_v0  ;;  %v89_v4 = vld [vmem:[%s4473_s0 + $0x40] sm:$0xff]  ;;  %v90_v5 = vld [vmem:[%s4473_s0 + $0x48] sm:$0xff]  ;;  %v84_v6 = vld [vmem:[%s4473_s0 + $0x18] sm:$0xff]  ;;  %s2690_s13 = smov 112   ;;  %s2691_s16 = smov 111  }
   0x3   :  { %v91_v7 = vld [vmem:[%s4473_s0 + $0x50] sm:$0xff]  ;;  %v115_v8 = vadd.f32 %v90_v5, %v89_v4  ;;  %v85_v9 = vld [vmem:[%s4473_s0 + $0x20] sm:$0xff]  ;;  %v92_v11 = vld [vmem:[%s4473_s0 + $0x58] sm:$0xff] }
   0x4   :  { %v106_v10 = vadd.f32 %v105_v3, %v83_v2  ;;  %v86_v12 = vld [vmem:[%s4473_s0 + $0x28] sm:$0xff]  ;;  %v87_v13 = vld [vmem:[%s4473_s0 + $0x30] sm:$0xff]  ;;  %v93_v16 = vld [vmem:[%s4473_s0 + $0x60] sm:$0xff] }
   0x5   :  { %v116_v14 = vadd.f32 %v115_v8, %v91_v7  ;;  %v110_v15 = vadd.f32 %v86_v12, %v85_v9  ;;  %v94_v17 = vld [vmem:[%s4473_s0 + $0x68] sm:$0xff]  ;;  %v95_v18 = vld [vmem:[%s4473_s0 + $0x70] sm:$0xff]  ;;  %v88_v20 = vld [vmem:[%s4473_s0 + $0x38] sm:$0xff] }
   0x6   :  { %v107_v19 = vadd.f32 %v106_v10, %v84_v6  ;;  %v120_v21 = vadd.f32 %v94_v17, %v93_v16  ;;  %v96_v24 = vld [vmem:[%s4473_s0 + $0x78] sm:$0xff] }
   0x7   :  { %v117_v22 = vadd.f32 %v116_v14, %v92_v11  ;;  %v111_v23 = vadd.f32 %v110_v15, %v87_v13 }
   0x8   :  { %108 = vadd.xlane.f32.xlu0 %v107_v19  ;;  %v121_v25 = vadd.f32 %v120_v21, %v95_v18  ;;  %v103_v19 = vld [vmem:[%s4474_s2 + $0x10] sm:$0xff] }
   0x9   :  { %118 = vadd.xlane.f32.xlu1 %v117_v22  ;;  %v112_v26 = vadd.f32 %v111_v23, %v88_v20 }
   0xa   :  { %v122_v27 = vadd.f32 %v121_v25, %v96_v24 }
   0xc   :  { %113 = vadd.xlane.f32.xlu0 %v112_v26 }
   0xd   :  { %123 = vadd.xlane.f32.xlu1 %v122_v27 }
  0x95   :  { %v109_v28 = vpop.xlane.xlu0 %108 }
  0x96   :  { %v125_v29 = vmul.f32 0.001953125, %v109_v28  ;;  %v119_v30 = vpop.xlane.xlu1 %118 }
  0x97   :  { %v127_v31 = vmul.f32 0.001953125, %v119_v30 }
  0x98   :  { %v2785_v32 = vsub.f32 %v81_v0, %v125_v29  ;;  %v2787_v33 = vsub.f32 %v82_v1, %v125_v29  ;;  %v2789_v34 = vsub.f32 %v83_v2, %v125_v29  ;;  %v2791_v35 = vsub.f32 %v84_v6, %v125_v29 }
  0x99   :  { %v114_v36 = vpop.xlane.xlu0 %113  ;;  %v2793_v37 = vsub.f32 %v89_v4, %v127_v31  ;;  %v2795_v38 = vsub.f32 %v90_v5, %v127_v31  ;;  %v2797_v39 = vsub.f32 %v91_v7, %v127_v31  ;;  %v2799_v40 = vsub.f32 %v92_v11, %v127_v31 }
  0x9a   :  { %v126_v41 = vmul.f32 0.001953125, %v114_v36  ;;  %v124_v42 = vpop.xlane.xlu1 %123  ;;  %v145_v43 = vmul.f32 %v2785_v32, %v2785_v32  ;;  %v146_v44 = vmul.f32 %v2787_v33, %v2787_v33  ;;  %v147_v46 = vmul.f32 %v2789_v34, %v2789_v34  ;;  %v97_v36 = vld [vmem:[%s4475_s1] sm:$0xff] }
  0x9b   :  { %v128_v45 = vmul.f32 0.001953125, %v124_v42  ;;  %v153_v47 = vmul.f32 %v2793_v37, %v2793_v37  ;;  %v154_v48 = vmul.f32 %v2795_v38, %v2795_v38  ;;  %v148_v49 = vmul.f32 %v2791_v35, %v2791_v35 }
  0x9c   :  { %v161_v50 = vadd.f32 %v146_v44, %v145_v43  ;;  %v155_v51 = vmul.f32 %v2797_v39, %v2797_v39  ;;  %v2815_v52 = vsub.f32 %v85_v9, %v126_v41  ;;  %v156_v53 = vmul.f32 %v2799_v40, %v2799_v40  ;;  %v98_v43 = vld [vmem:[%s4475_s1 + $0x8] sm:$0xff] }
  0x9d   :  { %v171_v54 = vadd.f32 %v154_v48, %v153_v47  ;;  %v2819_v55 = vsub.f32 %v86_v12, %v126_v41  ;;  %v2821_v56 = vsub.f32 %v87_v13, %v126_v41  ;;  %v2825_v59 = vsub.f32 %v93_v16, %v128_v45  ;;  %v99_v47 = vld [vmem:[%s4475_s1 + $0x10] sm:$0xff] }
  0x9e   :  { %v162_v57 = vadd.f32 %v161_v50, %v147_v46  ;;  %v149_v58 = vmul.f32 %v2815_v52, %v2815_v52  ;;  %v2827_v60 = vsub.f32 %v94_v17, %v128_v45  ;;  %v2829_v62 = vsub.f32 %v88_v20, %v126_v41  ;;  %v101_v17 = vld [vmem:[%s4474_s2] sm:$0xff]  ;;  %v100_v50 = vld [vmem:[%s4475_s1 + $0x18] sm:$0xff]  ;;  %s2684_s1 = smov 17  }
  0x9f   :  { %v172_v61 = vadd.f32 %v171_v54, %v155_v51  ;;  %v150_v63 = vmul.f32 %v2819_v55, %v2819_v55  ;;  %v2833_v1 = vsub.f32 %v95_v18, %v128_v45  ;;  %v2835_v2 = vsub.f32 %v96_v24, %v128_v45  ;;  %v102_v18 = vld [vmem:[%s4474_s2 + $0x8] sm:$0xff] }
  0xa0   :  { %v163_v0 = vadd.f32 %v162_v57, %v148_v49  ;;  %v157_v3 = vmul.f32 %v2825_v59, %v2825_v59  ;;  %v151_v4 = vmul.f32 %v2821_v56, %v2821_v56  ;;  %v158_v6 = vmul.f32 %v2827_v60, %v2827_v60 }
  0xa1   :  { %v166_v5 = vadd.f32 %v150_v63, %v149_v58  ;;  %v173_v7 = vadd.f32 %v172_v61, %v156_v53  ;;  %v159_v8 = vmul.f32 %v2833_v1, %v2833_v1  ;;  %v152_v9 = vmul.f32 %v2829_v62, %v2829_v62  ;;  %v104_v53 = vld [vmem:[%s4474_s2 + $0x18] sm:$0xff]  ;;  %s2685_s2 = smov 16  }
  0xa2   :  { %164 = vadd.xlane.f32.xlu0 %v163_v0  ;;  %v160_v11 = vmul.f32 %v2835_v2, %v2835_v2  ;;  %v176_v12 = vadd.f32 %v158_v6, %v157_v3  ;;  %v4549_v16 = vmov 0  }
  0xa3   :  { %v167_v10 = vadd.f32 %v166_v5, %v151_v4  ;;  %2562 = vset.pattern.permute.xlu1 %v4549_v16  ;;  %2561 = vset.pattern.permute.xlu0 %v4549_v16 }
  0xa4   :  { %v177_v14 = vadd.f32 %v176_v12, %v159_v8 }
  0xa5   :  { %v168_v13 = vadd.f32 %v167_v10, %v152_v9 }
  0xa6   :  { %174 = vadd.xlane.f32.xlu0 %v173_v7  ;;  %v178_v15 = vadd.f32 %v177_v14, %v160_v11 }
  0xa7   :  { %169 = vadd.xlane.f32.xlu1 %v168_v13 }
  0xab   :  { %179 = vadd.xlane.f32.xlu1 %v178_v15 }
  0xbc   :  { %235 = vperm.xlu1 %2562, %v101_v17  }
  0xc0   :  { %240 = vperm.xlu1 %2562, %v102_v18  }
  0xc4   :  { %245 = vperm.xlu1 %2562, %v103_v19  }
 0x12f   :  { %v165_v20 = vpop.xlane.xlu0 %164 }
 0x130   :  { %v181_v21 = vmul.f32 0.001953125, %v165_v20 }
 0x132   :  { %v185_v22 = vadd.f32 1e-05, %v181_v21 }
 0x133   :  { %v175_v23 = vpop.xlane.xlu0 %174 }
 0x134   :  { %2587 = vrsqrt.f32 %v185_v22  ;;  %v170_v24 = vpop.xlane.xlu1 %169  ;;  %v183_v25 = vmul.f32 0.001953125, %v175_v23 }
 0x135   :  { %v182_v26 = vmul.f32 0.001953125, %v170_v24 }
 0x136   :  { %v187_v28 = vadd.f32 1e-05, %v183_v25 }
 0x137   :  { %v186_v27 = vadd.f32 1e-05, %v182_v26 }
 0x138   :  { %v180_v29 = vpop.xlane.xlu1 %179 }
 0x139   :  { %2589 = vrsqrt.f32 %v186_v27  ;;  %v184_v30 = vmul.f32 0.001953125, %v180_v29 }
 0x13a   :  { %2591 = vrsqrt.f32 %v187_v28 }
 0x13b   :  { %v188_v31 = vadd.f32 1e-05, %v184_v30 }
 0x13c   :  { %v236_v54 = vpop.permute.xlu1 %235 }
 0x13d   :  { %2593 = vrsqrt.f32 %v188_v31 }
 0x13e   :  { %v2588_v41 = vpop.eup %2587 }
 0x13f   :  { %v193_v42 = vmul.f32 %v2588_v41, %v97_v36 }
 0x140   :  { %v241_v57 = vpop.permute.xlu1 %240 }
 0x141   :  { %199 = vperm.xlu0 %2561, %v193_v42  }
 0x143   :  { %v2590_v44 = vpop.eup %2589 }
 0x144   :  { %v194_v45 = vmul.f32 %v2590_v44, %v98_v43  ;;  %v2592_v46 = vpop.eup %2591  ;;  %v2875_v61 = vpop.permute.xlu1 %245 }
 0x145   :  { %v195_v48 = vmul.f32 %v2592_v46, %v99_v47 }
 0x146   :  { %204 = vperm.xlu1 %2562, %v194_v45  }
 0x147   :  { %v2594_v49 = vpop.eup %2593 }
 0x148   :  { %v196_v51 = vmul.f32 %v2594_v49, %v100_v50 }
 0x14a   :  { %209 = vperm.xlu1 %2562, %v195_v48  }
 0x14e   :  { %214 = vperm.xlu1 %2562, %v196_v51  }
 0x152   :  { %250 = vperm.xlu1 %2562, %v104_v53  }
 0x1c0   :  { %v200_v58 = vpop.permute.xlu0 %199 }
 0x1c1   :  { %v217_v63 = vmul.f32 %v200_v58, %v2785_v32  ;;  %v218_v0 = vmul.f32 %v200_v58, %v2787_v33  ;;  %v219_v3 = vmul.f32 %v200_v58, %v2789_v34  ;;  %v220_v4 = vmul.f32 %v200_v58, %v2791_v35 }
 0x1c3   :  { %v253_v5 = vadd.f32 %v236_v54, %v217_v63  ;;  %v254_v6 = vadd.f32 %v236_v54, %v218_v0  ;;  %v255_v7 = vadd.f32 %v236_v54, %v219_v3  ;;  %v256_v9 = vadd.f32 %v236_v54, %v220_v4 }
 0x1c5   :  { %v205_v8 = vpop.permute.xlu1 %204  ;;  %vm269_vm0 = vcmp.gt.f32.partialorder %v253_v5, 0.0  ;;  %v285_v11 = vmul.f32 0.01, %v253_v5  ;;  %vm270_vm1 = vcmp.gt.f32.partialorder %v254_v6, 0.0  ;;  %vm271_vm2 = vcmp.gt.f32.partialorder %v255_v7, 0.0 }
 0x1c6   :  { %v221_v10 = vmul.f32 %v205_v8, %v2815_v52  ;;  %v222_v12 = vmul.f32 %v205_v8, %v2819_v55  ;;  %v223_v13 = vmul.f32 %v205_v8, %v2821_v56  ;;  %v224_v32 = vmul.f32 %v205_v8, %v2829_v62 }
 0x1c7   :  { %v286_v33 = vmul.f32 0.01, %v254_v6  ;;  %v287_v35 = vmul.f32 0.01, %v255_v7  ;;  %vm272_vm3 = vcmp.gt.f32.partialorder %v256_v9, 0.0  ;;  %v301_v20 = vsel %vm269_vm0, %v253_v5, %v285_v11 }
 0x1c8   :  { %v257_v34 = vadd.f32 %v241_v57, %v221_v10  ;;  %v258_v14 = vadd.f32 %v241_v57, %v222_v12  ;;  %v259_v15 = vadd.f32 %v241_v57, %v223_v13  ;;  %v260_v17 = vadd.f32 %v241_v57, %v224_v32 }
 0x1c9   :  { %v210_v18 = vpop.permute.xlu1 %209  ;;  %v288_v19 = vmul.f32 0.01, %v256_v9  ;;  %v303_v31 = vsel %vm271_vm2, %v255_v7, %v287_v35  ;;  %v32_v32 = vlaneseq }
 0x1ca   :  { %vm273_vm4 = vcmp.gt.f32.partialorder %v257_v34, 0.0  ;;  %v289_v52 = vmul.f32 0.01, %v257_v34  ;;  %vm275_vm5 = vcmp.gt.f32.partialorder %v259_v15, 0.0  ;;  %vm276_vm6 = vcmp.gt.f32.partialorder %v260_v17, 0.0 }
 0x1cb   :  { %v225_v55 = vmul.f32 %v210_v18, %v2793_v37  ;;  %v290_v56 = vmul.f32 0.01, %v258_v14  ;;  %v291_v62 = vmul.f32 0.01, %v259_v15  ;;  %v292_v21 = vmul.f32 0.01, %v260_v17 }
 0x1cc   :  { %v305_v22 = vsel %vm273_vm4, %v257_v34, %v289_v52  ;;  %vm274_vm7 = vcmp.gt.f32.partialorder %v258_v14, 0.0  ;;  %v226_v24 = vmul.f32 %v210_v18, %v2795_v38  ;;  %v228_v25 = vmul.f32 %v210_v18, %v2799_v40 }
 0x1cd   :  { %v2887_v23 = vpack.c.bf16 %v305_v22, %v301_v20  ;;  %v215_v26 = vpop.permute.xlu1 %214  ;;  %v304_v27 = vsel %vm272_vm3, %v256_v9, %v288_v19  ;;  %v307_v28 = vsel %vm275_vm5, %v259_v15, %v291_v62  ;;  %v308_v29 = vsel %vm276_vm6, %v260_v17, %v292_v21 }
 0x1ce   :  { %v2892_v30 = vpack.c.bf16 %v308_v29, %v304_v27  ;;  %v302_v37 = vsel %vm270_vm1, %v254_v6, %v286_v33  ;;  %v306_v36 = vsel %vm274_vm7, %v258_v14, %v290_v56  ;;  %v227_v38 = vmul.f32 %v210_v18, %v2797_v39 }
 0x1cf   :  { %337 = vrot.lane.b32.xlu0 %v2887_v23, %s2684_s1  ;;  %v2899_v41 = vpack.c.bf16 %v307_v28, %v303_v31  ;;  %v261_v40 = vadd.f32 %v2875_v61, %v225_v55  ;;  %v262_v42 = vadd.f32 %v2875_v61, %v226_v24  ;;  %v264_v43 = vadd.f32 %v2875_v61, %v228_v25 }
 0x1d0   :  { %327 = vrot.lane.b32.xlu1 %v2892_v30, %s2684_s1  ;;  %v229_v45 = vmul.f32 %v215_v26, %v2825_v59  ;;  %v230_v46 = vmul.f32 %v215_v26, %v2827_v60  ;;  %v231_v47 = vmul.f32 %v215_v26, %v2833_v1  ;;  %v232_v39 = vmul.f32 %v215_v26, %v2835_v2 }
 0x1d1   :  { %v251_v44 = vpop.permute.xlu1 %250  ;;  %v2910_v48 = vpack.c.bf16 %v306_v36, %v302_v37  ;;  %v263_v54 = vadd.f32 %v2875_v61, %v227_v38  ;;  %v293_v57 = vmul.f32 0.01, %v261_v40  ;;  %vm277_vm8 = vcmp.gt.f32.partialorder %v261_v40, 0.0  ;;  %v2565_v36 = vld [vmem:[%s4476_s3 + $0x4] ss:$12 sps:$4 sm:$0xff]  }
 0x1d2   :  { %v265_v49 = vadd.f32 %v251_v44, %v229_v45  ;;  %v266_v50 = vadd.f32 %v251_v44, %v230_v46  ;;  %v267_v51 = vadd.f32 %v251_v44, %v231_v47  ;;  %v268_v53 = vadd.f32 %v251_v44, %v232_v39  ;;  %970 = vmatprep.mubr.bf16.mxu0 %v2565_v36 }
 0x1d3   :  { %341 = vrot.lane.b32.xlu0 %v2899_v41, %s2684_s1  ;;  %v294_v59 = vmul.f32 0.01, %v262_v42  ;;  %v296_v60 = vmul.f32 0.01, %v264_v43  ;;  %vm280_vm10 = vcmp.gt.f32.partialorder %v264_v43, 0.0  ;;  %v309_v3 = vsel %vm277_vm8, %v261_v40, %v293_v57  ;;  %1076 = vmatprep.mubr.bf16.mxu1 %v2565_v36 }
 0x1d4   :  { %339 = vrot.lane.b32.xlu1 %v2910_v48, %s2684_s1  ;;  %vm281_vm9 = vcmp.gt.f32.partialorder %v265_v49, 0.0  ;;  %vm284_vm11 = vcmp.gt.f32.partialorder %v268_v53, 0.0  ;;  %v297_v1 = vmul.f32 0.01, %v265_v49  ;;  %v299_v2 = vmul.f32 0.01, %v267_v51 }
 0x1d5   :  { %vm283_vm12 = vcmp.gt.f32.partialorder %v267_v51, 0.0  ;;  %v298_v58 = vmul.f32 0.01, %v266_v50  ;;  %v300_v63 = vmul.f32 0.01, %v268_v53  ;;  %vm282_vm13 = vcmp.gt.f32.partialorder %v266_v50, 0.0 }
 0x1d6   :  { %v295_v0 = vmul.f32 0.01, %v263_v54  ;;  %v313_v4 = vsel %vm281_vm9, %v265_v49, %v297_v1  ;;  %vm279_vm14 = vcmp.gt.f32.partialorder %v263_v54, 0.0  ;;  %v312_v61 = vsel %vm280_vm10, %v264_v43, %v296_v60 }
 0x1d7   :  { %v316_v5 = vsel %vm284_vm11, %v268_v53, %v300_v63  ;;  %v2917_v6 = vpack.c.bf16 %v313_v4, %v309_v3  ;;  %vm278_vm15 = vcmp.gt.f32.partialorder %v262_v42, 0.0  ;;  %v315_v7 = vsel %vm283_vm12, %v267_v51, %v299_v2 }
 0x1d8   :  { %v2919_v8 = vpack.c.bf16 %v316_v5, %v312_v61  ;;  %v314_v9 = vsel %vm282_vm13, %v266_v50, %v298_v58  ;;  %v311_v10 = vsel %vm279_vm14, %v263_v54, %v295_v0  ;;  %v310_v11 = vsel %vm278_vm15, %v262_v42, %v294_v59 }
 0x1d9   :  { %343 = vrot.lane.b32.xlu0 %v2917_v6, %s2684_s1  ;;  %v2925_v12 = vpack.c.bf16 %v315_v7, %v311_v10  ;;  %v2927_v13 = vpack.c.bf16 %v314_v9, %v310_v11  ;;  %v2974_v33 = vand.u32 127, %v32_v32  ;;  %v4580_v56 = vmov 0 }
 0x1da   :  { %329 = vrot.lane.b32.xlu1 %v2919_v8, %s2684_s1  ;;  %v4582_v62 = vmov 0  ;;  %v4584_v29 = vmov 0  ;;  %v4588_v31 = vmov 0  ;;  %v376_v38 = vshrl.u32 %v32_v32, 7 }
 0x1db   :  { %v2979_v34 = vadd.s32 256, %v2974_v33  ;;  %v2982_v35 = vadd.s32 384, %v2974_v33  ;;  %v3057_v21 = vadd.s32 128, %v2974_v33  ;;  %v41_v22 = vshra.s32 %v2974_v33, 4 }
 0x1dc   :  { %v37_v25 = vand.u32 15, %v2974_v33  ;;  %v3127_v40 = vsub.s32 4, %v376_v38  ;;  %v3132_v43 = vsub.s32 0, %v376_v38  ;;  %v4590_v51 = vmov 0 }
 0x1dd   :  { %347 = vrot.lane.b32.xlu0 %v2925_v12, %s2684_s1  ;;  %v43_v14 = vshra.s32 %v2979_v34, 4  ;;  %v44_v15 = vshra.s32 %v2982_v35, 4  ;;  %v39_v17 = vand.u32 15, %v2979_v34  ;;  %v40_v18 = vand.u32 15, %v2982_v35 }
 0x1de   :  { %345 = vrot.lane.b32.xlu1 %v2927_v13, %s2684_s1  ;;  %v42_v24 = vshra.s32 %v3057_v21, 4  ;;  %v3070_v26 = vand.u32 15, %v41_v22  ;;  %v38_v27 = vand.u32 15, %v3057_v21  ;;  %vm3084_vm10 = vcmp.ge.s32.totalorder %v37_v25, 1 }
 0x1df   :  { %v2996_v19 = vand.u32 15, %v43_v14  ;;  %v2998_v52 = vand.u32 15, %v44_v15  ;;  %vm3004_vm0 = vcmp.ge.s32.totalorder %v39_v17, 1  ;;  %vm3012_vm3 = vcmp.ge.s32.totalorder %v40_v18, 1 }
 0x1e0   :  { %v3073_v28 = vand.u32 15, %v42_v24  ;;  %vm4490_vm9 = vcmp.ge.s32.totalorder %v3070_v26, 1  ;;  %v4585_v29 = vsel %vm3084_vm10, 4294967295, %v4584_v29  ;;  %vm3099_vm13 = vcmp.ge.s32.totalorder %v38_v27, 1 }
 0x1e1   :  { %407 = vrot.lane.b32.xlu0 %v2887_v23, %s2685_s2  ;;  %vm4483_vm1 = vcmp.lt.s32.totalorder %v2996_v19, 15  ;;  %vm4482_vm2 = vcmp.lt.s32.totalorder %v2998_v52, 15  ;;  %vm4488_vm7 = vcmp.ge.s32.totalorder %v2996_v19, 1  ;;  %vm4487_vm8 = vcmp.ge.s32.totalorder %v2998_v52, 1  ;;  %vm57_vm15 = vmand %vm4490_vm9, %vm3084_vm10 }
 0x1e2   :  { %403 = vrot.lane.b32.xlu1 %v2892_v30, %s2685_s2  ;;  %vm3020_vm4 = vmand %vm4483_vm1, %vm3004_vm0  ;;  %vm4489_vm12 = vcmp.ge.s32.totalorder %v3073_v28, 1  ;;  %v4589_v31 = vsel %vm3099_vm13, 4294967295, %v4588_v31  ;;  %v4592_v54 = vmov 0  ;;  %v4594_v60 = vmov 0 }
 0x1e3   :  { %v4581_v56 = vsel %vm3020_vm4, 4294967295, %v4580_v56  ;;  %vm3030_vm5 = vmand %vm4482_vm2, %vm3012_vm3  ;;  %v4596_v1 = vmov 0  ;;  %vm4598_vm4 = vcmask 138240   ;;  %v4610_v33 = vmov 0 }
 0x1e4   :  { %v4583_v62 = vsel %vm3030_vm5, 4294967295, %v4582_v62  ;;  %vm3092_vm11 = vmand %vm4488_vm7, %vm3004_vm0  ;;  %v4636_v35 = vmov 0 }
 0x1e5   :  { %411 = vrot.lane.b32.xlu0 %v2899_v41, %s2685_s2  ;;  %vm60_vm14 = vmand %vm4487_vm8, %vm3012_vm3 }
 0x1e6   :  { %409 = vrot.lane.b32.xlu1 %v2910_v48, %s2685_s2  ;;  %vm58_vm2 = vmand %vm4489_vm12, %vm3099_vm13 }
 0x1e7   :  { %vm372_vm1 = vmpackc.low %vm60_vm14, %vm3092_vm11 }
 0x1e8   :  { %vm371_vm6 = vmpackc.low %vm58_vm2, %vm57_vm15  ;;  %v374_v42 = vsel %vm372_vm1, 65537, %v4549_v16  ;;  %vm4484_vm1 = vcmask 138240  }
 0x1e9   :  { %413 = vrot.lane.b32.xlu0 %v2917_v6, %s2685_s2  ;;  %v373_v44 = vsel %vm371_vm6, 65537, %v4549_v16  ;;  %v390_v45 = vrot.slane %v374_v42, %v3127_v40  ;;  %v386_v49 = vrot.slane %v374_v42, %v3132_v43  ;;  %vm442_vm15 = vmpackc.low %vm4487_vm8, %vm4488_vm7 }
 0x1ea   :  { %405 = vrot.lane.b32.xlu1 %v2919_v8, %s2685_s2  ;;  %v382_v47 = vrot.slane %v373_v44, %v3127_v40  ;;  %v378_v39 = vrot.slane %v373_v44, %v3132_v43  ;;  %v444_v9 = vsel %vm442_vm15, 65537, %v4549_v16  ;;  %vm4599_vm5 = vmmov %vm4598_vm4  ;;  %vm3235_vm15 = vcmp.lt.s32.totalorder %v40_v18, 15 }
 0x1eb   :  { %vm3145_vm2 = vcmp.ne.s16.totalorder %v390_v45, 0  ;;  %vm3161_vm14 = vcmp.ne.s16.totalorder %v386_v49, 0  ;;  %vm4600_vm8 = vmmov %vm4598_vm4  ;;  %v460_v36 = vrot.slane %v444_v9, %v3127_v40  ;;  %v456_v44 = vrot.slane %v444_v9, %v3132_v43 }
 0x1ec   :  { %v4591_v51 = vsel %vm3145_vm2, 4294967295, %v4590_v51  ;;  %vm3151_vm6 = vcmp.ne.s16.totalorder %v382_v47, 0  ;;  %vm3157_vm11 = vcmp.ne.s16.totalorder %v378_v39, 0  ;;  %v4597_v1 = vsel %vm3161_vm14, 4294967295, %v4596_v1  ;;  %vm4601_vm7 = vmmov %vm4598_vm4 }
 0x1ed   :  { %417 = vrot.lane.b32.xlu0 %v2925_v12, %s2685_s2  ;;  %v4593_v54 = vsel %vm3151_vm6, 4294967295, %v4592_v54  ;;  %v4595_v60 = vsel %vm3157_vm11, 4294967295, %v4594_v60  ;;  %v4604_v47 = vmov 0  ;;  %v4606_v39 = vmov 0 }
 0x1ee   :  { %415 = vrot.lane.b32.xlu1 %v2927_v13, %s2685_s2  ;;  %v4608_v49 = vmov 0  ;;  %v4611_v33 = vsel %vm3235_vm15, 4294967295, %v4610_v33 }
 0x1f1   :  { %477 = vrot.lane.b32.xlu0 %v2887_v23, %s2686_s9 }
 0x1f2   :  { %473 = vrot.lane.b32.xlu1 %v2892_v30, %s2686_s9 }
 0x1f5   :  { %481 = vrot.lane.b32.xlu0 %v2899_v41, %s2686_s9 }
 0x1f6   :  { %479 = vrot.lane.b32.xlu1 %v2910_v48, %s2686_s9 }
 0x1f9   :  { %483 = vrot.lane.b32.xlu0 %v2917_v6, %s2686_s9 }
 0x1fa   :  { %475 = vrot.lane.b32.xlu1 %v2919_v8, %s2686_s9 }
 0x1fd   :  { %487 = vrot.lane.b32.xlu0 %v2925_v12, %s2686_s9 }
 0x1fe   :  { %485 = vrot.lane.b32.xlu1 %v2927_v13, %s2686_s9 }
 0x201   :  { %547 = vrot.lane.b32.xlu0 %v2887_v23, %s2687_s10 }
 0x202   :  { %543 = vrot.lane.b32.xlu1 %v2892_v30, %s2687_s10 }
 0x205   :  { %551 = vrot.lane.b32.xlu0 %v2899_v41, %s2687_s10 }
 0x206   :  { %549 = vrot.lane.b32.xlu1 %v2910_v48, %s2687_s10 }
 0x209   :  { %553 = vrot.lane.b32.xlu0 %v2917_v6, %s2687_s10 }
 0x20a   :  { %545 = vrot.lane.b32.xlu1 %v2919_v8, %s2687_s10 }
 0x20d   :  { %557 = vrot.lane.b32.xlu0 %v2925_v12, %s2687_s10 }
 0x20e   :  { %555 = vrot.lane.b32.xlu1 %v2927_v13, %s2687_s10 }
 0x211   :  { %615 = vrot.lane.b32.xlu0 %v2910_v48, %s2688_s11 }
 0x212   :  { %613 = vrot.lane.b32.xlu1 %v2887_v23, %s2688_s11 }
 0x215   :  { %619 = vrot.lane.b32.xlu0 %v2892_v30, %s2688_s11 }
 0x216   :  { %617 = vrot.lane.b32.xlu1 %v2899_v41, %s2688_s11 }
 0x219   :  { %623 = vrot.lane.b32.xlu0 %v2927_v13, %s2688_s11 }
 0x21a   :  { %621 = vrot.lane.b32.xlu1 %v2917_v6, %s2688_s11 }
 0x21d   :  { %627 = vrot.lane.b32.xlu0 %v2919_v8, %s2688_s11 }
 0x21e   :  { %625 = vrot.lane.b32.xlu1 %v2925_v12, %s2688_s11 }
 0x221   :  { %685 = vrot.lane.b32.xlu0 %v2910_v48, %s2689_s12 }
 0x222   :  { %683 = vrot.lane.b32.xlu1 %v2887_v23, %s2689_s12 }
 0x225   :  { %689 = vrot.lane.b32.xlu0 %v2892_v30, %s2689_s12 }
 0x226   :  { %687 = vrot.lane.b32.xlu1 %v2899_v41, %s2689_s12 }
 0x229   :  { %693 = vrot.lane.b32.xlu0 %v2927_v13, %s2689_s12 }
 0x22a   :  { %691 = vrot.lane.b32.xlu1 %v2917_v6, %s2689_s12 }
 0x22d   :  { %697 = vrot.lane.b32.xlu0 %v2919_v8, %s2689_s12 }
 0x22e   :  { %695 = vrot.lane.b32.xlu1 %v2925_v12, %s2689_s12 }
 0x231   :  { %755 = vrot.lane.b32.xlu0 %v2910_v48, %s2690_s13 }
 0x232   :  { %753 = vrot.lane.b32.xlu1 %v2887_v23, %s2690_s13 }
 0x235   :  { %759 = vrot.lane.b32.xlu0 %v2892_v30, %s2690_s13 }
 0x236   :  { %757 = vrot.lane.b32.xlu1 %v2899_v41, %s2690_s13 }
 0x239   :  { %763 = vrot.lane.b32.xlu0 %v2927_v13, %s2690_s13 }
 0x23a   :  { %761 = vrot.lane.b32.xlu1 %v2917_v6, %s2690_s13 }
 0x23d   :  { %767 = vrot.lane.b32.xlu0 %v2919_v8, %s2690_s13 }
 0x23e   :  { %765 = vrot.lane.b32.xlu1 %v2925_v12, %s2690_s13 }
 0x241   :  { %v338_v46 = vpop.permute.xlu0 %337  ;;  %825 = vrot.lane.b32.xlu0 %v2910_v48, %s2691_s16 }
 0x242   :  { %v328_v50 = vpop.permute.xlu1 %327  ;;  %823 = vrot.lane.b32.xlu1 %v2887_v23, %s2691_s16 }
 0x243   :  { %v365_v59 = vsel %vm4484_vm1, %v328_v50, %v338_v46 }
 0x244   :  { %v395_v0 = vsel %vm3157_vm11, %v365_v59, 0 }
 0x245   :  { %v342_v53 = vpop.permute.xlu0 %341  ;;  %829 = vrot.lane.b32.xlu0 %v2892_v30, %s2691_s16 }
 0x246   :  { %v352_v57 = vsel %vm4484_vm1, %v342_v53, %v328_v50  ;;  %v340_v2 = vpop.permute.xlu1 %339  ;;  %827 = vrot.lane.b32.xlu1 %v2899_v41, %s2691_s16  ;;  %v4614_v50 = vmov 0 }
 0x247   :  { %2386 = vmatprep.subr.msk.bf16.mxu1 %vm3145_vm2, %v352_v57  ;;  %v350_v58 = vsel %vm4484_vm1, %v338_v46, %v340_v2  ;;  %v351_v63 = vsel %vm4484_vm1, %v340_v2, %v342_v53  ;;  %vm441_vm1 = vmpackc.low %vm4489_vm12, %vm4490_vm9  ;;  %v4602_v46 = vmov 0  ;;  %vm3244_vm9 = vcmp.ne.s16.totalorder %v456_v44, 0 }
 0x248   :  { %2368 = vmatprep.subr.msk.bf16.mxu0 %vm3151_vm6, %v350_v58  ;;  %v397_v3 = vsel %vm3161_vm14, %v351_v63, 0  ;;  %v443_v32 = vsel %vm441_vm1, 65537, %v4549_v16  ;;  %vm3229_vm1 = vcmp.ne.s16.totalorder %v460_v36, 0  ;;  %v4615_v50 = vsel %vm3244_vm9, 4294967295, %v4614_v50 }
 0x249   :  { %939 = vmatpush1.bf16.msra.mxu0 %v395_v0  ;;  %1045 = vmatpush1.bf16.msra.mxu1 %v397_v3  ;;  %v452_v37 = vrot.slane %v443_v32, %v3127_v40  ;;  %v448_v42 = vrot.slane %v443_v32, %v3132_v43  ;;  %v4609_v49 = vsel %vm3229_vm1, 4294967295, %v4608_v49  ;;  %v4616_v53 = vmov 0 }
 0x24a   :  { %833 = vrot.lane.b32.xlu0 %v2927_v13, %s2691_s16  ;;  %831 = vrot.lane.b32.xlu1 %v2917_v6, %s2691_s16 }
 0x24b   :  { %v344_v4 = vpop.permute.xlu0 %343  ;;  %vm3240_vm12 = vcmp.ne.s16.totalorder %v448_v42, 0  ;;  %v4630_v42 = vmov 0 }
 0x24c   :  { %v330_v61 = vpop.permute.xlu1 %329 }
 0x24d   :  { %v369_v7 = vsel %vm4598_vm4, %v330_v61, %v344_v4  ;;  %vm4505_vm4 = vcmask 130048  }
 0x24e   :  { %837 = vrot.lane.b32.xlu0 %v2919_v8, %s2691_s16  ;;  %835 = vrot.lane.b32.xlu1 %v2925_v12, %s2691_s16  ;;  %v399_v22 = vsel %vm3157_vm11, %v369_v7, 0 }
 0x24f   :  { %v348_v5 = vpop.permute.xlu0 %347 }
 0x250   :  { %v346_v10 = vpop.permute.xlu1 %345  ;;  %v355_v11 = vsel %vm4599_vm5, %v348_v5, %v330_v61  ;;  %vm3215_vm5 = vcmp.lt.s32.totalorder %v37_v25, 15 }
 0x251   :  { %v353_v14 = vsel %vm4600_vm8, %v344_v4, %v346_v10  ;;  %2387 = vmatprep.subr.msk.bf16.mxu1 %vm3145_vm2, %v355_v11  ;;  %v354_v15 = vsel %vm4601_vm7, %v346_v10, %v348_v5  ;;  %v4603_v46 = vsel %vm3215_vm5, 4294967295, %v4602_v46  ;;  %vm3221_vm7 = vcmp.lt.s32.totalorder %v39_v17, 15 }
 0x252   :  { %2369 = vmatprep.subr.msk.bf16.mxu0 %vm3151_vm6, %v353_v14  ;;  %v401_v24 = vsel %vm3161_vm14, %v354_v15, 0  ;;  %v4605_v47 = vsel %vm3221_vm7, 4294967295, %v4604_v47  ;;  %vm3225_vm8 = vcmp.ne.s16.totalorder %v452_v37, 0  ;;  %v4612_v17 = vmov 0 }
 0x253   :  { %941 = vmatpush1.bf16.msra.mxu0 %v399_v22  ;;  %1047 = vmatpush1.bf16.msra.mxu1 %v401_v24  ;;  %v408_v38 = vpop.permute.xlu0 %407  ;;  %v4607_v39 = vsel %vm3225_vm8, 4294967295, %v4606_v39  ;;  %v4613_v17 = vsel %vm3240_vm12, 4294967295, %v4612_v17  ;;  %vm3250_vm6 = vcmp.lt.s32.totalorder %v38_v27, 15  ;;  %vm4618_vm14 = vcmp.ge.s32.totalorder %v3070_v26, 1 }
 0x254   :  { %v404_v45 = vpop.permute.xlu1 %403  ;;  %v4617_v53 = vsel %vm3250_vm6, 4294967295, %v4616_v53  ;;  %vm3258_vm11 = vmand %vm4618_vm14, %vm3215_vm5  ;;  %vm4621_vm2 = vcmp.ge.s32.totalorder %v2996_v19, 1  ;;  %vm4624_vm14 = vcmp.ge.s32.totalorder %v2998_v52, 1 }
 0x255   :  { %v435_v34 = vsel %vm4505_vm4, %v404_v45, %v408_v38  ;;  %vm3267_vm13 = vmand %vm4621_vm2, %vm3221_vm7  ;;  %vm4625_vm2 = vcmp.ge.s32.totalorder %v3073_v28, 1 }
 0x256   :  { %vm68_vm5 = vmand %vm4624_vm14, %vm3235_vm15  ;;  %v465_v2 = vsel %vm3240_vm12, %v435_v34, 0  ;;  %vm4626_vm15 = vcmask 130048   ;;  %v4634_v34 = vmov 0 }
 0x257   :  { %v412_v25 = vpop.permute.xlu0 %411  ;;  %vm66_vm7 = vmand %vm4625_vm2, %vm3250_vm6 }
 0x258   :  { %v410_v18 = vpop.permute.xlu1 %409  ;;  %v422_v57 = vsel %vm4505_vm4, %v412_v25, %v404_v45  ;;  %vm512_vm14 = vmpackc.low %vm68_vm5, %vm3267_vm13  ;;  %v4632_v45 = vmov 0 }
 0x259   :  { %v420_v27 = vsel %vm4505_vm4, %v408_v38, %v410_v18  ;;  %2388 = vmatprep.subr.msk.bf16.mxu1 %vm3229_vm1, %v422_v57  ;;  %v421_v59 = vsel %vm4505_vm4, %v410_v18, %v412_v25  ;;  %vm511_vm4 = vmpackc.low %vm66_vm7, %vm3258_vm11  ;;  %v514_v61 = vsel %vm512_vm14, 65537, %v4549_v16  ;;  %vm4638_vm7 = vnez %v4585_v29 }
 0x25a   :  { %2370 = vmatprep.subr.msk.bf16.mxu0 %vm3225_vm8, %v420_v27  ;;  %v467_v58 = vsel %vm3244_vm9, %v421_v59, 0  ;;  %vm4627_vm10 = vmmov %vm4626_vm15  ;;  %v513_v9 = vsel %vm511_vm4, 65537, %v4549_v16  ;;  %v530_v15 = vrot.slane %v514_v61, %v3127_v40  ;;  %v526_v36 = vrot.slane %v514_v61, %v3132_v43 }
 0x25b   :  { %943 = vmatpush1.bf16.msra.mxu0 %v465_v2  ;;  %1049 = vmatpush1.bf16.msra.mxu1 %v467_v58  ;;  %v414_v63 = vpop.permute.xlu0 %413  ;;  %vm4628_vm2 = vmmov %vm4627_vm10  ;;  %v518_v24 = vrot.slane %v513_v9, %v3132_v43  ;;  %v522_v37 = vrot.slane %v513_v9, %v3127_v40 }
 0x25c   :  { %v406_v0 = vpop.permute.xlu1 %405  ;;  %vm4629_vm6 = vmmov %vm4628_vm2  ;;  %vm3311_vm13 = vcmp.ne.s16.totalorder %v530_v15, 0  ;;  %vm3324_vm4 = vcmp.ne.s16.totalorder %v526_v36, 0 }
 0x25d   :  { %v439_v4 = vsel %vm4626_vm15, %v406_v0, %v414_v63  ;;  %v4631_v42 = vsel %vm3311_vm13, 4294967295, %v4630_v42  ;;  %vm3320_vm11 = vcmp.ne.s16.totalorder %v518_v24, 0  ;;  %v4637_v35 = vsel %vm3324_vm4, 4294967295, %v4636_v35  ;;  %vm582_vm5 = vmpackc.low %vm3012_vm3, %vm3004_vm0 }
 0x25e   :  { %v469_v32 = vsel %vm3240_vm12, %v439_v4, 0  ;;  %v4635_v34 = vsel %vm3320_vm11, 4294967295, %v4634_v34  ;;  %vm4639_vm15 = vnez %v4589_v31  ;;  %v584_v4 = vsel %vm582_vm5, 65537, %v4549_v16 }
 0x25f   :  { %v418_v3 = vpop.permute.xlu0 %417  ;;  %vm581_vm14 = vmpackc.low %vm4639_vm15, %vm4638_vm7  ;;  %vm4523_vm0 = vcmask 7168  }
 0x260   :  { %v416_v5 = vpop.permute.xlu1 %415  ;;  %v425_v7 = vsel %vm4627_vm10, %v418_v3, %v406_v0  ;;  %vm4512_vm10 = vcmask 121856  }
 0x261   :  { %v423_v10 = vsel %vm4628_vm2, %v414_v63, %v416_v5  ;;  %2389 = vmatprep.subr.msk.bf16.mxu1 %vm3229_vm1, %v425_v7  ;;  %v424_v11 = vsel %vm4629_vm6, %v416_v5, %v418_v3  ;;  %vm3315_vm6 = vcmp.ne.s16.totalorder %v522_v37, 0  ;;  %v583_v7 = vsel %vm581_vm14, 65537, %v4549_v16 }
 0x262   :  { %2371 = vmatprep.subr.msk.bf16.mxu0 %vm3225_vm8, %v423_v10  ;;  %v471_v14 = vsel %vm3244_vm9, %v424_v11, 0  ;;  %v4633_v45 = vsel %vm3315_vm6, 4294967295, %v4632_v45  ;;  %v600_v11 = vrot.slane %v584_v4, %v3127_v40  ;;  %v592_v15 = vrot.slane %v583_v7, %v3127_v40 }
 0x263   :  { %945 = vmatpush1.bf16.msra.mxu0 %v469_v32  ;;  %1051 = vmatpush1.bf16.msra.mxu1 %v471_v14  ;;  %v478_v22 = vpop.permute.xlu0 %477  ;;  %v588_v14 = vrot.slane %v583_v7, %v3132_v43  ;;  %v4640_v37 = vmov 0 }
 0x264   :  { %v474_v38 = vpop.permute.xlu1 %473  ;;  %vm3365_vm3 = vcmp.ne.s16.totalorder %v600_v11, 0  ;;  %vm3369_vm2 = vcmp.ne.s16.totalorder %v592_v15, 0 }
 0x265   :  { %v505_v25 = vsel %vm4512_vm10, %v474_v38, %v478_v22  ;;  %v4641_v37 = vsel %vm3365_vm3, 4294967295, %v4640_v37  ;;  %vm3374_vm5 = vcmp.ne.s16.totalorder %v588_v14, 0 }
 0x266   :  { %v535_v59 = vsel %vm3320_vm11, %v505_v25, 0  ;;  %v4644_v25 = vmov 0 }
 0x267   :  { %v482_v44 = vpop.permute.xlu0 %481  ;;  %v4645_v25 = vsel %vm3374_vm5, 4294967295, %v4644_v25 }
 0x268   :  { %v480_v18 = vpop.permute.xlu1 %479  ;;  %v492_v57 = vsel %vm4512_vm10, %v482_v44, %v474_v38  ;;  %v4642_v38 = vmov 0 }
 0x269   :  { %v490_v21 = vsel %vm4512_vm10, %v478_v22, %v480_v18  ;;  %2390 = vmatprep.subr.msk.bf16.mxu1 %vm3311_vm13, %v492_v57  ;;  %v491_v27 = vsel %vm4512_vm10, %v480_v18, %v482_v44  ;;  %v596_v22 = vrot.slane %v584_v4, %v3132_v43  ;;  %v4643_v38 = vsel %vm3369_vm2, 4294967295, %v4642_v38 }
 0x26a   :  { %2372 = vmatprep.subr.msk.bf16.mxu0 %vm3315_vm6, %v490_v21  ;;  %v537_v2 = vsel %vm3324_vm4, %v491_v27, 0  ;;  %v4646_v18 = vmov 0 }
 0x26b   :  { %947 = vmatpush1.bf16.msra.mxu0 %v535_v59  ;;  %1053 = vmatpush1.bf16.msra.mxu1 %v537_v2  ;;  %v484_v58 = vpop.permute.xlu0 %483  ;;  %vm3378_vm14 = vcmp.ne.s16.totalorder %v596_v22, 0 }
 0x26c   :  { %v476_v63 = vpop.permute.xlu1 %475  ;;  %v4647_v18 = vsel %vm3378_vm14, 4294967295, %v4646_v18 }
 0x26d   :  { %v509_v3 = vsel %vm4512_vm10, %v476_v63, %v484_v58 }
 0x26e   :  { %v539_v9 = vsel %vm3320_vm11, %v509_v3, 0 }
 0x26f   :  { %v488_v0 = vpop.permute.xlu0 %487 }
 0x270   :  { %v486_v61 = vpop.permute.xlu1 %485  ;;  %v495_v5 = vsel %vm4512_vm10, %v488_v0, %v476_v63 }
 0x271   :  { %v493_v20 = vsel %vm4512_vm10, %v484_v58, %v486_v61  ;;  %2391 = vmatprep.subr.msk.bf16.mxu1 %vm3311_vm13, %v495_v5  ;;  %v494_v55 = vsel %vm4512_vm10, %v486_v61, %v488_v0  ;;  %vm4648_vm10 = vnez %v4603_v46  ;;  %vm4650_vm13 = vnez %v4605_v47 }
 0x272   :  { %2373 = vmatprep.subr.msk.bf16.mxu0 %vm3315_vm6, %v493_v20  ;;  %v541_v10 = vsel %vm3324_vm4, %v494_v55, 0  ;;  %vm4649_vm4 = vnez %v4617_v53  ;;  %vm4651_vm6 = vnez %v4611_v33 }
 0x273   :  { %949 = vmatpush1.bf16.msra.mxu0 %v539_v9  ;;  %1055 = vmatpush1.bf16.msra.mxu1 %v541_v10  ;;  %v548_v32 = vpop.permute.xlu0 %547  ;;  %vm651_vm11 = vmpackc.low %vm4649_vm4, %vm4648_vm10 }
 0x274   :  { %v544_v24 = vpop.permute.xlu1 %543  ;;  %vm652_vm9 = vmpackc.low %vm4651_vm6, %vm4650_vm13  ;;  %v653_v11 = vsel %vm651_vm11, 65537, %v4549_v16  ;;  %vm4656_vm11 = vcmp.lt.s32.totalorder %v3070_v26, 15 }
 0x275   :  { %v575_v44 = vsel %vm4523_vm0, %v544_v24, %v548_v32  ;;  %v654_v14 = vsel %vm652_vm9, 65537, %v4549_v16  ;;  %v662_v15 = vrot.slane %v653_v11, %v3127_v40 }
 0x276   :  { %v605_v2 = vsel %vm3374_vm5, %v575_v44, 0  ;;  %v670_v22 = vrot.slane %v654_v14, %v3127_v40  ;;  %v4652_v44 = vmov 0 }
 0x277   :  { %v552_v36 = vpop.permute.xlu0 %551  ;;  %vm3427_vm9 = vcmp.ne.s16.totalorder %v662_v15, 0 }
 0x278   :  { %v550_v57 = vpop.permute.xlu1 %549  ;;  %v562_v21 = vsel %vm4523_vm0, %v552_v36, %v544_v24  ;;  %v658_v24 = vrot.slane %v653_v11, %v3132_v43  ;;  %v4653_v44 = vsel %vm3427_vm9, 4294967295, %v4652_v44 }
 0x279   :  { %v560_v27 = vsel %vm4523_vm0, %v548_v32, %v550_v57  ;;  %2392 = vmatprep.subr.msk.bf16.mxu1 %vm3365_vm3, %v562_v21  ;;  %v561_v59 = vsel %vm4523_vm0, %v550_v57, %v552_v36  ;;  %v4654_v57 = vmov 0 }
 0x27a   :  { %2374 = vmatprep.subr.msk.bf16.mxu0 %vm3369_vm2, %v560_v27  ;;  %v607_v58 = vsel %vm3378_vm14, %v561_v59, 0 }
 0x27b   :  { %951 = vmatpush1.bf16.msra.mxu0 %v605_v2  ;;  %1057 = vmatpush1.bf16.msra.mxu1 %v607_v58  ;;  %v554_v63 = vpop.permute.xlu0 %553  ;;  %v4668_v2 = vmov 0 }
 0x27c   :  { %v546_v0 = vpop.permute.xlu1 %545 }
 0x27d   :  { %v579_v4 = vsel %vm4523_vm0, %v546_v0, %v554_v63 }
 0x27e   :  { %v609_v55 = vsel %vm3374_vm5, %v579_v4, 0  ;;  %vm3439_vm5 = vmand %vm4656_vm11, %vm4638_vm7 }
 0x27f   :  { %v558_v3 = vpop.permute.xlu0 %557 }
 0x280   :  { %v556_v61 = vpop.permute.xlu1 %555  ;;  %v565_v5 = vsel %vm4523_vm0, %v558_v3, %v546_v0 }
 0x281   :  { %v563_v7 = vsel %vm4523_vm0, %v554_v63, %v556_v61  ;;  %2393 = vmatprep.subr.msk.bf16.mxu1 %vm3365_vm3, %v565_v5  ;;  %v564_v20 = vsel %vm4523_vm0, %v556_v61, %v558_v3  ;;  %vm3431_vm0 = vcmp.ne.s16.totalorder %v670_v22, 0  ;;  %vm3444_vm3 = vcmp.ne.s16.totalorder %v658_v24, 0 }
 0x282   :  { %2375 = vmatprep.subr.msk.bf16.mxu0 %vm3369_vm2, %v563_v7  ;;  %v611_v9 = vsel %vm3378_vm14, %v564_v20, 0  ;;  %v4655_v57 = vsel %vm3431_vm0, 4294967295, %v4654_v57  ;;  %vm4659_vm14 = vcmask 1039360   ;;  %vm4662_vm2 = vcmp.lt.s32.totalorder %v3073_v28, 15 }
 0x283   :  { %953 = vmatpush1.bf16.msra.mxu0 %v609_v55  ;;  %1059 = vmatpush1.bf16.msra.mxu1 %v611_v9  ;;  %v616_v10 = vpop.permute.xlu0 %615  ;;  %vm3452_vm12 = vmand %vm4662_vm2, %vm4639_vm15 }
 0x284   :  { %v614_v32 = vpop.permute.xlu1 %613  ;;  %954 = vmatprep.subr.bf16.mxu0 %v2910_v48  ;;  %1060 = vmatprep.subr.bf16.mxu1 %v2892_v30  ;;  %v666_v48 = vrot.slane %v654_v14, %v3132_v43  ;;  %vm4665_vm7 = vmmov %vm4659_vm14 }
 0x285   :  { %vm4666_vm11 = vmmov %vm4665_vm7 }
 0x286   :  { %vm3461_vm1 = vcmp.ne.s16.totalorder %v666_v48, 0  ;;  %vm721_vm15 = vmpackc.low %vm3452_vm12, %vm3439_vm5  ;;  %v4683_v48 = vmov 0 }
 0x287   :  { %955 = vmatpush1.bf16.msra.mxu0 %v2887_v23  ;;  %1061 = vmatpush1.bf16.msra.mxu1 %v2899_v41  ;;  %v620_v36 = vpop.permute.xlu0 %619  ;;  %v630_v41 = vsel %vm4659_vm14, %v614_v32, %v616_v10  ;;  %vm4667_vm14 = vmmov %vm4665_vm7  ;;  %v4669_v2 = vsel %vm3461_vm1, 4294967295, %v4668_v2  ;;  %v723_v61 = vsel %vm721_vm15, 65537, %v4549_v16 }
 0x288   :  { %v618_v30 = vpop.permute.xlu1 %617  ;;  %956 = vmatprep.subr.bf16.mxu0 %v2927_v13  ;;  %1062 = vmatprep.subr.bf16.mxu1 %v2919_v8  ;;  %v4660_v8 = vmov 0  ;;  %v645_v21 = vsel %vm4666_vm11, %v620_v36, %v614_v32  ;;  %vm4670_vm2 = vmmov %vm4665_vm7  ;;  %vm4672_vm11 = vnez %v4581_v56  ;;  %v728_v9 = vrot.slane %v723_v61, %v3132_v43 }
 0x289   :  { %v4661_v8 = vsel %vm3444_vm3, 4294967295, %v4660_v8  ;;  %v631_v29 = vsel %vm4665_vm7, %v616_v10, %v618_v30  ;;  %v632_v59 = vsel %vm4667_vm14, %v618_v30, %v620_v36  ;;  %vm4671_vm7 = vnez %v4583_v62  ;;  %vm4674_vm12 = vmmov %vm4670_vm2 }
 0x28a   :  { %vm4673_vm14 = vmpackc.low %vm4671_vm7, %vm4672_vm11  ;;  %v732_v10 = vrot.slane %v723_v61, %v3127_v40  ;;  %vm3509_vm7 = vcmp.ne.s16.totalorder %v728_v9, 0 }
 0x28b   :  { %957 = vmatpush1.bf16.msra.mxu0 %v2917_v6  ;;  %1063 = vmatpush1.bf16.msra.mxu1 %v2925_v12  ;;  %v624_v27 = vpop.permute.xlu0 %623  ;;  %v675_v6 = vsel %vm3444_vm3, %v630_v41, 0  ;;  %v677_v12 = vsel %vm3461_vm1, %v632_v59, 0  ;;  %v724_v0 = vsel %vm4673_vm14, 65537, %v4549_v16  ;;  %vm4675_vm5 = vmmov %vm4670_vm2  ;;  %vm4685_vm14 = vcmp.lt.s32.totalorder %v2996_v19, 15 }
 0x28c   :  { %v622_v31 = vpop.permute.xlu1 %621  ;;  %2376 = vmatprep.subr.msk.bf16.mxu0 %vm3427_vm9, %v631_v29  ;;  %2394 = vmatprep.subr.msk.bf16.mxu1 %vm3431_vm0, %v645_v21  ;;  %vm4676_vm8 = vmmov %vm4670_vm2  ;;  %v740_v20 = vrot.slane %v724_v0, %v3127_v40  ;;  %v736_v11 = vrot.slane %v724_v0, %v3132_v43 }
 0x28d   :  { %v633_v63 = vsel %vm4670_vm2, %v622_v31, %v624_v27  ;;  %vm3504_vm2 = vcmp.ne.s16.totalorder %v732_v10, 0  ;;  %v4693_v10 = vmov 0 }
 0x28e   :  { %v679_v56 = vsel %vm3444_vm3, %v633_v63, 0  ;;  %vm3500_vm15 = vcmp.ne.s16.totalorder %v740_v20, 0  ;;  %vm3513_vm11 = vcmp.ne.s16.totalorder %v736_v11, 0 }
 0x28f   :  { %959 = vmatpush1.bf16.msra.mxu0 %v675_v6  ;;  %1065 = vmatpush1.bf16.msra.mxu1 %v677_v12  ;;  %v628_v58 = vpop.permute.xlu0 %627  ;;  %v4684_v48 = vsel %vm3513_vm11, 4294967295, %v4683_v48 }
 0x290   :  { %v626_v3 = vpop.permute.xlu1 %625  ;;  %v649_v4 = vsel %vm4674_vm12, %v628_v58, %v622_v31  ;;  %vm4686_vm12 = vcmp.lt.s32.totalorder %v2998_v52, 15 }
 0x291   :  { %v634_v5 = vsel %vm4675_vm5, %v624_v27, %v626_v3  ;;  %2395 = vmatprep.subr.msk.bf16.mxu1 %vm3431_vm0, %v649_v4  ;;  %v635_v7 = vsel %vm4676_vm8, %v626_v3, %v628_v58  ;;  %vm4538_vm8 = vcmask 924672   ;;  %vm792_vm5 = vmpackc.low %vm4686_vm12, %vm4685_vm14  ;;  %vm4689_vm0 = vcmask 924672  }
 0x292   :  { %2377 = vmatprep.subr.msk.bf16.mxu0 %vm3427_vm9, %v634_v5  ;;  %v681_v62 = vsel %vm3461_vm1, %v635_v7, 0  ;;  %vm4688_vm1 = vcmp.lt.s32.totalorder %v3073_v28, 15  ;;  %v794_v12 = vsel %vm792_vm5, 65537, %v4549_v16  ;;  %vm4690_vm9 = vmmov %vm4689_vm0  ;;  %vm4706_vm5 = vcmp.lt.s32.totalorder %v2996_v19, 15 }
 0x293   :  { %961 = vmatpush1.bf16.msra.mxu0 %v679_v56  ;;  %1067 = vmatpush1.bf16.msra.mxu1 %v681_v62  ;;  %v686_v55 = vpop.permute.xlu0 %685  ;;  %vm4691_vm4 = vmmov %vm4689_vm0  ;;  %v810_v7 = vrot.slane %v794_v12, %v3127_v40 }
 0x294   :  { %v684_v32 = vpop.permute.xlu1 %683  ;;  %vm4692_vm14 = vmmov %vm4689_vm0 }
 0x295   :  { %v700_v24 = vsel %vm4538_vm8, %v684_v32, %v686_v55 }
 0x296   :  { %v745_v29 = vsel %vm3509_vm7, %v700_v24, 0  ;;  %v4698_v24 = vmov 0 }
 0x297   :  { %v690_v15 = vpop.permute.xlu0 %689 }
 0x298   :  { %v688_v30 = vpop.permute.xlu1 %687  ;;  %v715_v23 = vsel %vm4538_vm8, %v690_v15, %v684_v32 }
 0x299   :  { %v701_v41 = vsel %vm4538_vm8, %v686_v55, %v688_v30  ;;  %2396 = vmatprep.subr.msk.bf16.mxu1 %vm3500_vm15, %v715_v23  ;;  %v702_v13 = vsel %vm4538_vm8, %v688_v30, %v690_v15  ;;  %vm4687_vm8 = vcmp.lt.s32.totalorder %v3070_v26, 15  ;;  %v806_v55 = vrot.slane %v794_v12, %v3132_v43 }
 0x29a   :  { %2378 = vmatprep.subr.msk.bf16.mxu0 %vm3504_vm2, %v701_v41  ;;  %v747_v21 = vsel %vm3513_vm11, %v702_v13, 0  ;;  %vm791_vm3 = vmpackc.low %vm4688_vm1, %vm4687_vm8  ;;  %vm4557_vm1 = vcmask 916480   ;;  %v4701_v30 = vmov 0 }
 0x29b   :  { %963 = vmatpush1.bf16.msra.mxu0 %v745_v29  ;;  %1069 = vmatpush1.bf16.msra.mxu1 %v747_v21  ;;  %v694_v27 = vpop.permute.xlu0 %693  ;;  %v793_v0 = vsel %vm791_vm3, 65537, %v4549_v16  ;;  %vm3575_vm12 = vmand %vm4687_vm8, %vm4648_vm10  ;;  %vm4709_vm10 = vcmp.lt.s32.totalorder %v2998_v52, 15 }
 0x29c   :  { %v692_v59 = vpop.permute.xlu1 %691  ;;  %v798_v62 = vrot.slane %v793_v0, %v3132_v43  ;;  %v802_v20 = vrot.slane %v793_v0, %v3127_v40  ;;  %vm80_vm8 = vmand %vm4709_vm10, %vm4651_vm6  ;;  %v2563_v0 = vld [vmem:[%s4476_s3] ss:$12 sps:$4 sm:$0xff]  }
 0x29d   :  { %v703_v6 = vsel %vm4689_vm0, %v692_v59, %v694_v27 }
 0x29e   :  { %v749_v61 = vsel %vm3509_vm7, %v703_v6, 0  ;;  %vm3558_vm0 = vcmp.ne.s16.totalorder %v802_v20, 0  ;;  %vm3563_vm3 = vcmp.ne.s16.totalorder %v798_v62, 0  ;;  %v4712_v20 = vmov 0 }
 0x29f   :  { %v698_v31 = vpop.permute.xlu0 %697  ;;  %v4699_v24 = vsel %vm3563_vm3, 4294967295, %v4698_v24 }
 0x2a0   :  { %v696_v58 = vpop.permute.xlu1 %695  ;;  %v719_v63 = vsel %vm4690_vm9, %v698_v31, %v692_v59  ;;  %4700 = vst [vmem:[#allocation3_spill] sm:$0xff] %v4699_v24  ;;  %vm3567_vm9 = vcmp.ne.s16.totalorder %v806_v55, 0  ;;  %v4715_v55 = vmov 0 }
 0x2a1   :  { %v704_v3 = vsel %vm4691_vm4, %v694_v27, %v696_v58  ;;  %2397 = vmatprep.subr.msk.bf16.mxu1 %vm3500_vm15, %v719_v63  ;;  %v705_v4 = vsel %vm4692_vm14, %v696_v58, %v698_v31  ;;  %vm3554_vm4 = vcmp.ne.s16.totalorder %v810_v7, 0  ;;  %v4702_v30 = vsel %vm3567_vm9, 4294967295, %v4701_v30  ;;  %vm3584_vm14 = vmand %vm4706_vm5, %vm4650_vm13 }
 0x2a2   :  { %2379 = vmatprep.subr.msk.bf16.mxu0 %vm3504_vm2, %v704_v3  ;;  %v751_v5 = vsel %vm3513_vm11, %v705_v4, 0  ;;  %v4694_v10 = vsel %vm3554_vm4, 4294967295, %v4693_v10  ;;  %4703 = vst [vmem:[#allocation4_spill] sm:$0xff] %v4702_v30  ;;  %vm4710_vm13 = vnez %v4617_v53  ;;  %vm4711_vm5 = vcmp.lt.s32.totalorder %v3073_v28, 15  ;;  %vm862_vm6 = vmpackc.low %vm80_vm8, %vm3584_vm14 }
 0x2a3   :  { %965 = vmatpush1.bf16.msra.mxu0 %v749_v61  ;;  %1071 = vmatpush1.bf16.msra.mxu1 %v751_v5  ;;  %v756_v56 = vpop.permute.xlu0 %755  ;;  %4695 = vst [vmem:[#allocation2_spill] sm:$0xff] %v4694_v10  ;;  %vm78_vm11 = vmand %vm4711_vm5, %vm4710_vm13  ;;  %v864_v59 = vsel %vm862_vm6, 65537, %v4549_v16  ;;  %vm4555_vm5 = vcmask 261120  }
 0x2a4   :  { %v754_v9 = vpop.permute.xlu1 %753  ;;  %vm861_vm10 = vmpackc.low %vm78_vm11, %vm3575_vm12  ;;  %v880_v3 = vrot.slane %v864_v59, %v3127_v40  ;;  %v876_v5 = vrot.slane %v864_v59, %v3132_v43  ;;  %vm4556_vm11 = vcmask 908288  }
 0x2a5   :  { %v770_v15 = vsel %vm4557_vm1, %v754_v9, %v756_v56  ;;  %v863_v28 = vsel %vm861_vm10, 65537, %v4549_v16 }
 0x2a6   :  { %v815_v19 = vsel %vm3563_vm3, %v770_v15, 0  ;;  %v868_v4 = vrot.slane %v863_v28, %v3132_v43  ;;  %v872_v7 = vrot.slane %v863_v28, %v3127_v40  ;;  %vm3634_vm12 = vcmp.ne.s16.totalorder %v880_v3, 0 }
 0x2a7   :  { %v760_v11 = vpop.permute.xlu0 %759  ;;  %v4713_v20 = vsel %vm3634_vm12, 4294967295, %v4712_v20  ;;  %vm3643_vm8 = vcmp.ne.s16.totalorder %v876_v5, 0  ;;  %v4718_v40 = vmov 0 }
 0x2a8   :  { %v758_v41 = vpop.permute.xlu1 %757  ;;  %v785_v13 = vsel %vm4557_vm1, %v760_v11, %v754_v9  ;;  %4714 = vst [vmem:[#allocation5_spill] sm:$0xff] %v4713_v20  ;;  %vm3638_vm14 = vcmp.ne.s16.totalorder %v868_v4, 0  ;;  %v4719_v40 = vsel %vm3643_vm8, 4294967295, %v4718_v40  ;;  %vm3647_vm13 = vcmp.ne.s16.totalorder %v872_v7, 0 }
 0x2a9   :  { %v771_v21 = vsel %vm4557_vm1, %v756_v56, %v758_v41  ;;  %2398 = vmatprep.subr.msk.bf16.mxu1 %vm3554_vm4, %v785_v13  ;;  %v772_v26 = vsel %vm4557_vm1, %v758_v41, %v760_v11  ;;  %v2566_v56 = vld [vmem:[%s4476_s3 + $0x1c] ss:$12 sps:$4 sm:$0xff]   ;;  %v4716_v55 = vsel %vm3638_vm14, 4294967295, %v4715_v55  ;;  %4720 = vst [vmem:[#allocation7_spill] sm:$0xff] %v4719_v40  ;;  %v4721_v11 = vmov 0 }
 0x2aa   :  { %2380 = vmatprep.subr.msk.bf16.mxu0 %vm3558_vm0, %v771_v21  ;;  %v817_v46 = vsel %vm3567_vm9, %v772_v26, 0  ;;  %4717 = vst [vmem:[#allocation6_spill] sm:$0xff] %v4716_v55  ;;  %v4722_v11 = vsel %vm3647_vm13, 4294967295, %v4721_v11  ;;  %v2568_v26 = vld [vmem:[%s4476_s3 + $0x18] ss:$12 sps:$4 sm:$0xff]  }
 0x2ab   :  { %967 = vmatpush1.bf16.msra.mxu0 %v815_v19  ;;  %1073 = vmatpush1.bf16.msra.mxu1 %v817_v46  ;;  %v764_v47 = vpop.permute.xlu0 %763  ;;  %4723 = vst [vmem:[#allocation8_spill] sm:$0xff] %v4722_v11 }
 0x2ac   :  { %v762_v33 = vpop.permute.xlu1 %761 }
 0x2ad   :  { %v773_v27 = vsel %vm4557_vm1, %v762_v33, %v764_v47 }
 0x2ae   :  { %v819_v58 = vsel %vm3563_vm3, %v773_v27, 0 }
 0x2af   :  { %v768_v52 = vpop.permute.xlu0 %767 }
 0x2b0   :  { %v766_v31 = vpop.permute.xlu1 %765  ;;  %v789_v53 = vsel %vm4557_vm1, %v768_v52, %v762_v33 }
 0x2b1   :  { %v774_v6 = vsel %vm4557_vm1, %v764_v47, %v766_v31  ;;  %v775_v12 = vsel %vm4557_vm1, %v766_v31, %v768_v52  ;;  %2399 = vmatprep.subr.msk.bf16.mxu1 %vm3554_vm4, %v789_v53 }
 0x2b2   :  { %2381 = vmatprep.subr.msk.bf16.mxu0 %vm3558_vm0, %v774_v6  ;;  %v821_v63 = vsel %vm3567_vm9, %v775_v12, 0  ;;  %v2569_v6 = vld [vmem:[%s4476_s3 + $0x8] ss:$12 sps:$4 sm:$0xff]   ;;  %v2570_v12 = vld [vmem:[%s4476_s3 + $0x20] ss:$12 sps:$4 sm:$0xff]  }
 0x2b3   :  { %969 = vmatpush1.bf16.msra.mxu0 %v819_v58  ;;  %1075 = vmatpush1.bf16.msra.mxu1 %v821_v63  ;;  %v826_v61 = vpop.permute.xlu0 %825 }
 0x2b4   :  { %v824_v62 = vpop.permute.xlu1 %823 }
 0x2b5   :  { %v840_v43 = vsel %vm4556_vm11, %v824_v62, %v826_v61 }
 0x2b6   :  { %971 = vmatmul.mubr.bf16.vlgmr.msra.gmra.mrb[0].mxu0 %v2563_v0  ;;  %1077 = vmatmul.mubr.bf16.vlgmr.msra.gmra.mrb[0].mxu1 %v2563_v0  ;;  %v885_v29 = vsel %vm3638_vm14, %v840_v43, 0 }
 0x2b7   :  { %v830_v9 = vpop.permute.xlu0 %829  ;;  %980 = vmatprep.mubr.bf16.mxu0 %v2566_v56  ;;  %1086 = vmatprep.mubr.bf16.mxu1 %v2566_v56 }
 0x2b8   :  { %v828_v15 = vpop.permute.xlu1 %827  ;;  %v855_v23 = vsel %vm4556_vm11, %v830_v9, %v824_v62 }
 0x2b9   :  { %v841_v41 = vsel %vm4556_vm11, %v826_v61, %v828_v15  ;;  %v842_v13 = vsel %vm4556_vm11, %v828_v15, %v830_v9  ;;  %2400 = vmatprep.subr.msk.bf16.mxu1 %vm3634_vm12, %v855_v23 }
 0x2ba   :  { %v887_v21 = vsel %vm3643_vm8, %v842_v13, 0  ;;  %2382 = vmatprep.subr.msk.bf16.mxu0 %vm3647_vm13, %v841_v41 }
 0x2bb   :  { %992 = vmatpush1.bf16.msra.mxu0 %v885_v29  ;;  %1098 = vmatpush1.bf16.msra.mxu1 %v887_v21 }
 0x2bc   :  { %v834_v19 = vpop.permute.xlu0 %833  ;;  %v832_v46 = vpop.permute.xlu1 %831 }
 0x2bd   :  { %v843_v47 = vsel %vm4556_vm11, %v832_v46, %v834_v19 }
 0x2be   :  { %981 = vmatmul.mubr.bf16.gmra.mrb[4].mxu0 %v2568_v26  ;;  %1087 = vmatmul.mubr.bf16.gmra.mrb[4].mxu1 %v2568_v26  ;;  %v889_v53 = vsel %vm3638_vm14, %v843_v47, 0 }
 0x2bf   :  { %1023 = vmatprep.mubr.bf16.mxu0 %v4549_v16  ;;  %1129 = vmatprep.mubr.bf16.mxu1 %v4549_v16 }
 0x2c0   :  { %v838_v33 = vpop.permute.xlu0 %837  ;;  %v836_v52 = vpop.permute.xlu1 %835 }
 0x2c1   :  { %v859_v27 = vsel %vm4556_vm11, %v838_v33, %v832_v46  ;;  %v844_v59 = vsel %vm4556_vm11, %v834_v19, %v836_v52  ;;  %v845_v31 = vsel %vm4556_vm11, %v836_v52, %v838_v33 }
 0x2c2   :  { %2401 = vmatprep.subr.msk.bf16.mxu1 %vm3634_vm12, %v859_v27  ;;  %v891_v28 = vsel %vm3643_vm8, %v845_v31, 0  ;;  %2383 = vmatprep.subr.msk.bf16.mxu0 %vm3647_vm13, %v844_v59  ;;  %vm4735_vm12 = vcmask 130048  }
 0x2c3   :  { %994 = vmatpush1.bf16.msra.mxu0 %v889_v53  ;;  %1100 = vmatpush1.bf16.msra.mxu1 %v891_v28 }
 0x2c6   :  { %2384 = vmatmul.mubr.msk.bf16.vlgmr.msra.gmra.mrb[0].mxu0 %vm4555_vm5, %v2569_v6  ;;  %2402 = vmatmul.mubr.msk.bf16.vlgmr.msra.gmra.mrb[0].mxu1 %vm4555_vm5, %v2569_v6 }
 0x2c7   :  { %1033 = vmatprep.mubr.bf16.mxu0 %v4549_v16  ;;  %1139 = vmatprep.mubr.bf16.mxu1 %v4549_v16 }
 0x2ce   :  { %2385 = vmatmul.mubr.msk.bf16.gmra.mrb[4].mxu0 %vm4555_vm5, %v2570_v12  ;;  %2403 = vmatmul.mubr.msk.bf16.gmra.mrb[4].mxu1 %vm4555_vm5, %v2570_v12 }
 0x399   :  { %v1025_v58 = vpop.f32.mrb[0].mxu0  ;;  %v1131_v63 = vpop.f32.mrb[0].mxu1 }
 0x39a   :  { %v1027_v0 = vpop.f32.mrb[1].mxu0  ;;  %v1133_v3 = vpop.f32.mrb[1].mxu1 }
 0x39b   :  { %v1158_v4 = vadd.f32 %v1027_v0, %v1025_v58  ;;  %v1029_v61 = vpop.f32.mrb[2].mxu0  ;;  %v1135_v5 = vpop.f32.mrb[2].mxu1 }
 0x39c   :  { %v1031_v7 = vpop.f32.mrb[3].mxu0  ;;  %v1137_v56 = vpop.f32.mrb[3].mxu1 }
 0x39d   :  { %v1163_v62 = vadd.f32 %v1031_v7, %v1029_v61  ;;  %v1159_v43 = vadd.f32 %v1158_v4, %v1131_v63 }
 0x39f   :  { %v1160_v9 = vadd.f32 %v1159_v43, %v1133_v3  ;;  %v1164_v15 = vadd.f32 %v1163_v62, %v1135_v5 }
 0x3a1   :  { %v1035_v23 = vpop.f32.mrb[4].mxu0  ;;  %1161 = vadd.xlane.f32.xlu1 %v1160_v9  ;;  %v1141_v41 = vpop.f32.mrb[4].mxu1  ;;  %v1165_v13 = vadd.f32 %v1164_v15, %v1137_v56 }
 0x3a2   :  { %v1037_v29 = vpop.f32.mrb[5].mxu0  ;;  %v1143_v21 = vpop.f32.mrb[5].mxu1 }
 0x3a3   :  { %v1168_v26 = vadd.f32 %v1037_v29, %v1035_v23  ;;  %v1039_v19 = vpop.f32.mrb[6].mxu0  ;;  %1166 = vadd.xlane.f32.xlu0 %v1165_v13  ;;  %v1145_v46 = vpop.f32.mrb[6].mxu1 }
 0x3a4   :  { %v1041_v47 = vpop.f32.mrb[7].mxu0  ;;  %v1147_v33 = vpop.f32.mrb[7].mxu1 }
 0x3a5   :  { %v1173_v52 = vadd.f32 %v1041_v47, %v1039_v19  ;;  %v1169_v27 = vadd.f32 %v1168_v26, %v1141_v41 }
 0x3a7   :  { %v1170_v59 = vadd.f32 %v1169_v27, %v1143_v21  ;;  %v1174_v31 = vadd.f32 %v1173_v52, %v1145_v46 }
 0x3a9   :  { %1171 = vadd.xlane.f32.xlu0 %v1170_v59  ;;  %v1175_v53 = vadd.f32 %v1174_v31, %v1147_v33 }
 0x3ab   :  { %1176 = vadd.xlane.f32.xlu1 %v1175_v53 }
 0x42e   :  { %v1162_v28 = vpop.xlane.xlu1 %1161 }
 0x42f   :  { %v1178_v6 = vmul.f32 0.001953125, %v1162_v28 }
 0x430   :  { %v1167_v12 = vpop.xlane.xlu0 %1166 }
 0x431   :  { %v3691_v4 = vsub.f32 %v1025_v58, %v1178_v6  ;;  %v3693_v62 = vsub.f32 %v1027_v0, %v1178_v6  ;;  %v1179_v43 = vmul.f32 0.001953125, %v1167_v12  ;;  %v3695_v9 = vsub.f32 %v1131_v63, %v1178_v6 }
 0x432   :  { %v3697_v15 = vsub.f32 %v1133_v3, %v1178_v6 }
 0x433   :  { %v3699_v13 = vsub.f32 %v1029_v61, %v1179_v43  ;;  %v3701_v26 = vsub.f32 %v1031_v7, %v1179_v43  ;;  %v1198_v52 = vmul.f32 %v3691_v4, %v3691_v4  ;;  %v1199_v27 = vmul.f32 %v3693_v62, %v3693_v62 }
 0x434   :  { %v3707_v59 = vsub.f32 %v1135_v5, %v1179_v43  ;;  %v1200_v58 = vmul.f32 %v3695_v9, %v3695_v9  ;;  %v3715_v7 = vsub.f32 %v1137_v56, %v1179_v43  ;;  %v1201_v53 = vmul.f32 %v3697_v15, %v3697_v15 }
 0x435   :  { %v1214_v0 = vadd.f32 %v1199_v27, %v1198_v52  ;;  %v1202_v63 = vmul.f32 %v3699_v13, %v3699_v13  ;;  %v1203_v3 = vmul.f32 %v3701_v26, %v3701_v26 }
 0x436   :  { %v1172_v61 = vpop.xlane.xlu0 %1171  ;;  %v1204_v12 = vmul.f32 %v3707_v59, %v3707_v59  ;;  %v1205_v56 = vmul.f32 %v3715_v7, %v3715_v7 }
 0x437   :  { %v1180_v31 = vmul.f32 0.001953125, %v1172_v61  ;;  %v1215_v28 = vadd.f32 %v1214_v0, %v1200_v58  ;;  %v1219_v5 = vadd.f32 %v1203_v3, %v1202_v63 }
 0x438   :  { %v1177_v6 = vpop.xlane.xlu1 %1176 }
 0x439   :  { %v3721_v52 = vsub.f32 %v1035_v23, %v1180_v31  ;;  %v3723_v27 = vsub.f32 %v1037_v29, %v1180_v31  ;;  %v1181_v16 = vmul.f32 0.001953125, %v1177_v6  ;;  %v1216_v11 = vadd.f32 %v1215_v28, %v1201_v53 }
 0x43a   :  { %v1220_v43 = vadd.f32 %v1219_v5, %v1204_v12  ;;  %v3727_v61 = vsub.f32 %v1141_v41, %v1180_v31  ;;  %v3729_v40 = vsub.f32 %v1143_v21, %v1180_v31  ;;  %v1154_v12 = vld [vmem:[%s4477_s5] sm:$0xff] }
 0x43b   :  { %v3731_v58 = vsub.f32 %v1039_v19, %v1181_v16  ;;  %v3733_v0 = vsub.f32 %v1041_v47, %v1181_v16  ;;  %1217 = vadd.xlane.f32.xlu0 %v1216_v11  ;;  %v1206_v23 = vmul.f32 %v3721_v52, %v3721_v52  ;;  %v1207_v29 = vmul.f32 %v3723_v27, %v3723_v27 }
 0x43c   :  { %v1221_v63 = vadd.f32 %v1220_v43, %v1205_v56  ;;  %v1208_v3 = vmul.f32 %v3727_v61, %v3727_v61  ;;  %v3741_v53 = vsub.f32 %v1145_v46, %v1181_v16  ;;  %v3743_v21 = vsub.f32 %v1147_v33, %v1181_v16  ;;  %v1155_v56 = vld [vmem:[%s4477_s5 + $0x8] sm:$0xff] }
 0x43d   :  { %v1224_v41 = vadd.f32 %v1207_v29, %v1206_v23  ;;  %v1210_v19 = vmul.f32 %v3731_v58, %v3731_v58  ;;  %v1211_v11 = vmul.f32 %v3733_v0, %v3733_v0  ;;  %v1209_v47 = vmul.f32 %v3729_v40, %v3729_v40 }
 0x43e   :  { %1222 = vadd.xlane.f32.xlu1 %v1221_v63  ;;  %v1212_v28 = vmul.f32 %v3741_v53, %v3741_v53  ;;  %v1213_v16 = vmul.f32 %v3743_v21, %v3743_v21 }
 0x43f   :  { %v1225_v31 = vadd.f32 %v1224_v41, %v1208_v3  ;;  %v1229_v5 = vadd.f32 %v1211_v11, %v1210_v19 }
 0x441   :  { %v1226_v46 = vadd.f32 %v1225_v31, %v1209_v47  ;;  %v1230_v33 = vadd.f32 %v1229_v5, %v1212_v28 }
 0x443   :  { %1227 = vadd.xlane.f32.xlu0 %v1226_v46  ;;  %v1231_v6 = vadd.f32 %v1230_v33, %v1213_v16  ;;  %v1150_v46 = vld [vmem:[%s4478_s4] sm:$0xff] }
 0x445   :  { %1232 = vadd.xlane.f32.xlu1 %v1231_v6  ;;  %v1151_v6 = vld [vmem:[%s4478_s4 + $0x8] sm:$0xff] }
 0x456   :  { %1288 = vperm.xlu1 %2562, %v1154_v12  }
 0x459   :  { %1293 = vperm.xlu0 %2561, %v1155_v56  }
 0x4c8   :  { %v1218_v43 = vpop.xlane.xlu0 %1217 }
 0x4c9   :  { %v1234_v23 = vmul.f32 0.001953125, %v1218_v43  ;;  %v1152_v43 = vld [vmem:[%s4478_s4 + $0x10] sm:$0xff] }
 0x4cb   :  { %v1238_v29 = vadd.f32 1e-05, %v1234_v23  ;;  %v1223_v63 = vpop.xlane.xlu1 %1222 }
 0x4cc   :  { %v1235_v3 = vmul.f32 0.001953125, %v1223_v63 }
 0x4cd   :  { %2595 = vrsqrt.f32 %v1238_v29  ;;  %v1153_v29 = vld [vmem:[%s4478_s4 + $0x18] sm:$0xff] }
 0x4ce   :  { %v1239_v41 = vadd.f32 1e-05, %v1235_v3 }
 0x4d0   :  { %2597 = vrsqrt.f32 %v1239_v41  ;;  %v1228_v19 = vpop.xlane.xlu0 %1227 }
 0x4d1   :  { %v1236_v11 = vmul.f32 0.001953125, %v1228_v19  ;;  %v1156_v19 = vld [vmem:[%s4477_s5 + $0x10] sm:$0xff] }
 0x4d2   :  { %v1233_v47 = vpop.xlane.xlu1 %1232 }
 0x4d3   :  { %v1240_v31 = vadd.f32 1e-05, %v1236_v11  ;;  %v1237_v28 = vmul.f32 0.001953125, %v1233_v47  ;;  %v1157_v11 = vld [vmem:[%s4477_s5 + $0x18] sm:$0xff] }
 0x4d5   :  { %2599 = vrsqrt.f32 %v1240_v31  ;;  %v1241_v5 = vadd.f32 1e-05, %v1237_v28 }
 0x4d6   :  { %v1289_v31 = vpop.permute.xlu1 %1288 }
 0x4d7   :  { %v2596_v16 = vpop.eup %2595  ;;  %2601 = vrsqrt.f32 %v1241_v5 }
 0x4d8   :  { %v1246_v33 = vmul.f32 %v2596_v16, %v1150_v46  ;;  %v1294_v47 = vpop.permute.xlu0 %1293 }
 0x4da   :  { %v2598_v12 = vpop.eup %2597  ;;  %1252 = vperm.xlu0 %2561, %v1246_v33  }
 0x4db   :  { %v1247_v56 = vmul.f32 %v2598_v12, %v1151_v6 }
 0x4dd   :  { %1257 = vperm.xlu1 %2562, %v1247_v56  }
 0x4df   :  { %v2600_v23 = vpop.eup %2599 }
 0x4e0   :  { %v1248_v63 = vmul.f32 %v2600_v23, %v1152_v43 }
 0x4e1   :  { %v2602_v3 = vpop.eup %2601 }
 0x4e2   :  { %1262 = vperm.xlu1 %2562, %v1248_v63   ;;  %v1249_v41 = vmul.f32 %v2602_v3, %v1153_v29 }
 0x4e4   :  { %1267 = vperm.xlu0 %2561, %v1249_v41  }
 0x4e6   :  { %1298 = vperm.xlu1 %2562, %v1156_v19  }
 0x4e8   :  { %1303 = vperm.xlu0 %2561, %v1157_v11  }
 0x559   :  { %v1253_v28 = vpop.permute.xlu0 %1252 }
 0x55a   :  { %v1270_v5 = vmul.f32 %v1253_v28, %v3691_v4  ;;  %v1273_v46 = vmul.f32 %v1253_v28, %v3697_v15  ;;  %v1272_v16 = vmul.f32 %v1253_v28, %v3695_v9  ;;  %v1271_v29 = vmul.f32 %v1253_v28, %v3693_v62 }
 0x55c   :  { %v1306_v33 = vadd.f32 %v1289_v31, %v1270_v5  ;;  %v1258_v6 = vpop.permute.xlu1 %1257  ;;  %v1309_v63 = vadd.f32 %v1289_v31, %v1273_v46  ;;  %v1308_v41 = vadd.f32 %v1289_v31, %v1272_v16  ;;  %v1307_v9 = vadd.f32 %v1289_v31, %v1271_v29 }
 0x55d   :  { %v1274_v12 = vmul.f32 %v1258_v6, %v3699_v13  ;;  %v1275_v56 = vmul.f32 %v1258_v6, %v3701_v26  ;;  %v1276_v43 = vmul.f32 %v1258_v6, %v3707_v59  ;;  %v1277_v23 = vmul.f32 %v1258_v6, %v3715_v7 }
 0x55e   :  { %v1338_v11 = vmul.f32 0.01, %v1306_v33  ;;  %vm1322_vm6 = vcmp.gt.f32.partialorder %v1306_v33, 0.0  ;;  %v1341_v5 = vmul.f32 0.01, %v1309_v63  ;;  %vm1325_vm5 = vcmp.gt.f32.partialorder %v1309_v63, 0.0 }
 0x55f   :  { %v1310_v3 = vadd.f32 %v1294_v47, %v1274_v12  ;;  %v1311_v4 = vadd.f32 %v1294_v47, %v1275_v56  ;;  %v1312_v19 = vadd.f32 %v1294_v47, %v1276_v43  ;;  %v1313_v15 = vadd.f32 %v1294_v47, %v1277_v23 }
 0x560   :  { %vm1324_vm1 = vcmp.gt.f32.partialorder %v1308_v41, 0.0  ;;  %v1340_v62 = vmul.f32 0.01, %v1308_v41  ;;  %v1354_v28 = vsel %vm1322_vm6, %v1306_v33, %v1338_v11  ;;  %v1339_v16 = vmul.f32 0.01, %v1307_v9 }
 0x561   :  { %vm1326_vm10 = vcmp.gt.f32.partialorder %v1310_v3, 0.0  ;;  %vm1329_vm11 = vcmp.gt.f32.partialorder %v1313_v15, 0.0  ;;  %v1342_v13 = vmul.f32 0.01, %v1310_v3  ;;  %v1344_v26 = vmul.f32 0.01, %v1312_v19 }
 0x562   :  { %vm1328_vm13 = vcmp.gt.f32.partialorder %v1312_v19, 0.0  ;;  %v1343_v59 = vmul.f32 0.01, %v1311_v4  ;;  %v1345_v7 = vmul.f32 0.01, %v1313_v15  ;;  %vm1327_vm8 = vcmp.gt.f32.partialorder %v1311_v4, 0.0 }
 0x563   :  { %v1358_v46 = vsel %vm1326_vm10, %v1310_v3, %v1342_v13  ;;  %v1357_v6 = vsel %vm1325_vm5, %v1309_v63, %v1341_v5  ;;  %vm1323_vm14 = vcmp.gt.f32.partialorder %v1307_v9, 0.0  ;;  %v1360_v31 = vsel %vm1328_vm13, %v1312_v19, %v1344_v26  ;;  %v1268_v3 = vpop.permute.xlu0 %1267 }
 0x564   :  { %v1361_v47 = vsel %vm1329_vm11, %v1313_v15, %v1345_v7  ;;  %v3787_v12 = vpack.c.bf16 %v1358_v46, %v1354_v28  ;;  %v1359_v43 = vsel %vm1327_vm8, %v1311_v4, %v1343_v59  ;;  %v1356_v23 = vsel %vm1324_vm1, %v1308_v41, %v1340_v62  ;;  %v1263_v41 = vpop.permute.xlu1 %1262 }
 0x565   :  { %v3789_v56 = vpack.c.bf16 %v1361_v47, %v1357_v6  ;;  %v1355_v33 = vsel %vm1323_vm14, %v1307_v9, %v1339_v16  ;;  %v3796_v29 = vpack.c.bf16 %v1360_v31, %v1356_v23  ;;  %v1282_v19 = vmul.f32 %v1268_v3, %v3731_v58 }
 0x566   :  { %1390 = vrot.lane.b32.xlu0 %v3787_v12, %s2684_s1  ;;  %v3798_v63 = vpack.c.bf16 %v1359_v43, %v1355_v33  ;;  %v1285_v15 = vmul.f32 %v1268_v3, %v3743_v21  ;;  %v1278_v9 = vmul.f32 %v1263_v41, %v3721_v52  ;;  %v1281_v13 = vmul.f32 %v1263_v41, %v3729_v40 }
 0x567   :  { %1380 = vrot.lane.b32.xlu1 %v3789_v56, %s2684_s1  ;;  %v1304_v4 = vpop.permute.xlu0 %1303  ;;  %v1284_v59 = vmul.f32 %v1268_v3, %v3741_v53  ;;  %v1283_v58 = vmul.f32 %v1268_v3, %v3733_v0  ;;  %v1280_v21 = vmul.f32 %v1263_v41, %v3727_v61  ;;  %v1279_v46 = vmul.f32 %v1263_v41, %v3723_v27 }
 0x568   :  { %v1299_v11 = vpop.permute.xlu1 %1298  ;;  %v1318_v5 = vadd.f32 %v1304_v4, %v1282_v19  ;;  %v1321_v26 = vadd.f32 %v1304_v4, %v1285_v15 }
 0x569   :  { %v1314_v7 = vadd.f32 %v1299_v11, %v1278_v9  ;;  %v1317_v62 = vadd.f32 %v1299_v11, %v1281_v13  ;;  %v1320_v28 = vadd.f32 %v1304_v4, %v1284_v59  ;;  %v1319_v40 = vadd.f32 %v1304_v4, %v1283_v58  ;;  %v2573_v59 = vld [vmem:[%s4479_s6 + $0x4] ss:$12 sps:$4 sm:$0xff]  }
 0x56a   :  { %1394 = vrot.lane.b32.xlu0 %v3796_v29, %s2684_s1  ;;  %v1350_v52 = vmul.f32 0.01, %v1318_v5  ;;  %vm1334_vm1 = vcmp.gt.f32.partialorder %v1318_v5, 0.0  ;;  %v1353_v16 = vmul.f32 0.01, %v1321_v26  ;;  %v1316_v53 = vadd.f32 %v1299_v11, %v1280_v21  ;;  %1906 = vmatprep.mubr.bf16.mxu0 %v2573_v59 }
 0x56b   :  { %1392 = vrot.lane.b32.xlu1 %v3798_v63, %s2684_s1  ;;  %v1346_v6 = vmul.f32 0.01, %v1314_v7  ;;  %vm1337_vm11 = vcmp.gt.f32.partialorder %v1321_v26, 0.0  ;;  %v1315_v0 = vadd.f32 %v1299_v11, %v1279_v46  ;;  %vm1330_vm14 = vcmp.gt.f32.partialorder %v1314_v7, 0.0  ;;  %2052 = vmatprep.mubr.bf16.mxu1 %v2573_v59 }
 0x56c   :  { %v1349_v47 = vmul.f32 0.01, %v1317_v62  ;;  %vm1333_vm8 = vcmp.gt.f32.partialorder %v1317_v62, 0.0  ;;  %v1352_v61 = vmul.f32 0.01, %v1320_v28  ;;  %v1366_v31 = vsel %vm1334_vm1, %v1318_v5, %v1350_v52 }
 0x56d   :  { %vm1336_vm13 = vcmp.gt.f32.partialorder %v1320_v28, 0.0  ;;  %v1351_v27 = vmul.f32 0.01, %v1319_v40  ;;  %v1369_v43 = vsel %vm1337_vm11, %v1321_v26, %v1353_v16  ;;  %v1348_v23 = vmul.f32 0.01, %v1316_v53 }
 0x56e   :  { %1434 = vrot.lane.b32.xlu0 %v3787_v12, %s2685_s2  ;;  %v1362_v33 = vsel %vm1330_vm14, %v1314_v7, %v1346_v6  ;;  %vm1335_vm5 = vcmp.gt.f32.partialorder %v1319_v40, 0.0  ;;  %vm1332_vm6 = vcmp.gt.f32.partialorder %v1316_v53, 0.0  ;;  %v1347_v3 = vmul.f32 0.01, %v1315_v0 }
 0x56f   :  { %1430 = vrot.lane.b32.xlu1 %v3789_v56, %s2685_s2  ;;  %v1365_v41 = vsel %vm1333_vm8, %v1317_v62, %v1349_v47  ;;  %v3852_v4 = vpack.c.bf16 %v1366_v31, %v1362_v33  ;;  %vm1331_vm10 = vcmp.gt.f32.partialorder %v1315_v0, 0.0  ;;  %v1368_v19 = vsel %vm1336_vm13, %v1320_v28, %v1352_v61  ;;  %v1759_v47 = vld [vmem:[%s4480_s7 + $0x28] sm:$0xff]  ;;  %v1758_v31 = vld [vmem:[%s4480_s7 + $0x20] sm:$0xff]  ;;  %v1760_v33 = vld [vmem:[%s4480_s7 + $0x30] sm:$0xff] }
 0x570   :  { %v3854_v15 = vpack.c.bf16 %v1369_v43, %v1365_v41  ;;  %v1367_v11 = vsel %vm1335_vm5, %v1319_v40, %v1351_v27  ;;  %v1364_v9 = vsel %vm1332_vm6, %v1316_v53, %v1348_v23  ;;  %v1363_v5 = vsel %vm1331_vm10, %v1315_v0, %v1347_v3  ;;  %v1761_v43 = vld [vmem:[%s4480_s7 + $0x38] sm:$0xff]  ;;  %v1755_v41 = vld [vmem:[%s4480_s7 + $0x8] sm:$0xff] }
 0x571   :  { %v3860_v13 = vpack.c.bf16 %v1368_v19, %v1364_v9  ;;  %v3862_v26 = vpack.c.bf16 %v1367_v11, %v1363_v5  ;;  %vm4724_vm1 = vcmask 138240   ;;  %vm4728_vm13 = vnez %v4591_v51  ;;  %v1754_v11 = vld [vmem:[%s4480_s7] sm:$0xff]  ;;  %v1757_v5 = vld [vmem:[%s4480_s7 + $0x18] sm:$0xff] }
 0x572   :  { %1438 = vrot.lane.b32.xlu0 %v3796_v29, %s2685_s2  ;;  %vm4725_vm11 = vmmov %vm4724_vm1  ;;  %vm4729_vm5 = vnez %v4595_v60  ;;  %vm4730_vm6 = vnez %v4597_v1  ;;  %vm4731_vm10 = vnez %v4593_v54 }
 0x573   :  { %1436 = vrot.lane.b32.xlu1 %v3798_v63, %s2685_s2  ;;  %vm4726_vm14 = vmmov %vm4724_vm1 }
 0x574   :  { %vm4727_vm8 = vmmov %vm4724_vm1 }
 0x576   :  { %1478 = vrot.lane.b32.xlu0 %v3787_v12, %s2686_s9 }
 0x577   :  { %1474 = vrot.lane.b32.xlu1 %v3789_v56, %s2686_s9 }
 0x57a   :  { %1482 = vrot.lane.b32.xlu0 %v3796_v29, %s2686_s9 }
 0x57b   :  { %1480 = vrot.lane.b32.xlu1 %v3798_v63, %s2686_s9 }
 0x57e   :  { %1522 = vrot.lane.b32.xlu0 %v3787_v12, %s2687_s10 }
 0x57f   :  { %1518 = vrot.lane.b32.xlu1 %v3789_v56, %s2687_s10 }
 0x582   :  { %1526 = vrot.lane.b32.xlu0 %v3796_v29, %s2687_s10 }
 0x583   :  { %1524 = vrot.lane.b32.xlu1 %v3798_v63, %s2687_s10 }
 0x586   :  { %1564 = vrot.lane.b32.xlu0 %v3798_v63, %s2688_s11 }
 0x587   :  { %1562 = vrot.lane.b32.xlu1 %v3787_v12, %s2688_s11 }
 0x58a   :  { %1568 = vrot.lane.b32.xlu0 %v3789_v56, %s2688_s11 }
 0x58b   :  { %1566 = vrot.lane.b32.xlu1 %v3796_v29, %s2688_s11 }
 0x58e   :  { %1608 = vrot.lane.b32.xlu0 %v3798_v63, %s2689_s12 }
 0x58f   :  { %1606 = vrot.lane.b32.xlu1 %v3787_v12, %s2689_s12 }
 0x592   :  { %1612 = vrot.lane.b32.xlu0 %v3789_v56, %s2689_s12 }
 0x593   :  { %1610 = vrot.lane.b32.xlu1 %v3796_v29, %s2689_s12 }
 0x596   :  { %1396 = vrot.lane.b32.xlu0 %v3852_v4, %s2684_s1 }
 0x597   :  { %1382 = vrot.lane.b32.xlu1 %v3854_v15, %s2684_s1 }
 0x59a   :  { %1400 = vrot.lane.b32.xlu0 %v3860_v13, %s2684_s1 }
 0x59b   :  { %1398 = vrot.lane.b32.xlu1 %v3862_v26, %s2684_s1 }
 0x59e   :  { %1440 = vrot.lane.b32.xlu0 %v3852_v4, %s2685_s2 }
 0x59f   :  { %1432 = vrot.lane.b32.xlu1 %v3854_v15, %s2685_s2 }
 0x5a2   :  { %1444 = vrot.lane.b32.xlu0 %v3860_v13, %s2685_s2 }
 0x5a3   :  { %1442 = vrot.lane.b32.xlu1 %v3862_v26, %s2685_s2 }
 0x5a6   :  { %1484 = vrot.lane.b32.xlu0 %v3852_v4, %s2686_s9 }
 0x5a7   :  { %1476 = vrot.lane.b32.xlu1 %v3854_v15, %s2686_s9 }
 0x5aa   :  { %1488 = vrot.lane.b32.xlu0 %v3860_v13, %s2686_s9 }
 0x5ab   :  { %1486 = vrot.lane.b32.xlu1 %v3862_v26, %s2686_s9 }
 0x5ae   :  { %1528 = vrot.lane.b32.xlu0 %v3852_v4, %s2687_s10 }
 0x5af   :  { %1520 = vrot.lane.b32.xlu1 %v3854_v15, %s2687_s10 }
 0x5b2   :  { %1532 = vrot.lane.b32.xlu0 %v3860_v13, %s2687_s10 }
 0x5b3   :  { %1530 = vrot.lane.b32.xlu1 %v3862_v26, %s2687_s10 }
 0x5b6   :  { %1652 = vrot.lane.b32.xlu0 %v3798_v63, %s2690_s13 }
 0x5b7   :  { %1650 = vrot.lane.b32.xlu1 %v3787_v12, %s2690_s13 }
 0x5ba   :  { %1656 = vrot.lane.b32.xlu0 %v3789_v56, %s2690_s13 }
 0x5bb   :  { %1654 = vrot.lane.b32.xlu1 %v3796_v29, %s2690_s13 }
 0x5be   :  { %1572 = vrot.lane.b32.xlu0 %v3862_v26, %s2688_s11 }
 0x5bf   :  { %1570 = vrot.lane.b32.xlu1 %v3852_v4, %s2688_s11 }
 0x5c2   :  { %1576 = vrot.lane.b32.xlu0 %v3854_v15, %s2688_s11 }
 0x5c3   :  { %1574 = vrot.lane.b32.xlu1 %v3860_v13, %s2688_s11 }
 0x5c6   :  { %1616 = vrot.lane.b32.xlu0 %v3862_v26, %s2689_s12 }
 0x5c7   :  { %1614 = vrot.lane.b32.xlu1 %v3852_v4, %s2689_s12 }
 0x5ca   :  { %1620 = vrot.lane.b32.xlu0 %v3854_v15, %s2689_s12 }
 0x5cb   :  { %1618 = vrot.lane.b32.xlu1 %v3860_v13, %s2689_s12 }
 0x5ce   :  { %1660 = vrot.lane.b32.xlu0 %v3862_v26, %s2690_s13 }
 0x5cf   :  { %1658 = vrot.lane.b32.xlu1 %v3852_v4, %s2690_s13 }
 0x5d2   :  { %1664 = vrot.lane.b32.xlu0 %v3854_v15, %s2690_s13 }
 0x5d3   :  { %1662 = vrot.lane.b32.xlu1 %v3860_v13, %s2690_s13 }
 0x5d6   :  { %1696 = vrot.lane.b32.xlu0 %v3798_v63, %s2691_s16 }
 0x5d7   :  { %1694 = vrot.lane.b32.xlu1 %v3787_v12, %s2691_s16 }
 0x5d8   :  { %v1391_v7 = vpop.permute.xlu0 %1390 }
 0x5d9   :  { %v1381_v58 = vpop.permute.xlu1 %1380 }
 0x5da   :  { %1700 = vrot.lane.b32.xlu0 %v3789_v56, %s2691_s16  ;;  %v1416_v62 = vsel %vm4724_vm1, %v1381_v58, %v1391_v7 }
 0x5db   :  { %1698 = vrot.lane.b32.xlu1 %v3796_v29, %s2691_s16  ;;  %v1422_v16 = vsel %vm4729_vm5, %v1416_v62, 0 }
 0x5dc   :  { %v1395_v21 = vpop.permute.xlu0 %1394 }
 0x5dd   :  { %v1404_v28 = vsel %vm4725_vm11, %v1395_v21, %v1381_v58  ;;  %v1393_v52 = vpop.permute.xlu1 %1392  ;;  %vm4732_vm11 = vmmov %vm4724_vm1 }
 0x5de   :  { %v1402_v46 = vsel %vm4726_vm14, %v1391_v7, %v1393_v52  ;;  %v1403_v40 = vsel %vm4727_vm8, %v1393_v52, %v1395_v21  ;;  %1704 = vrot.lane.b32.xlu0 %v3862_v26, %s2691_s16  ;;  %2436 = vmatprep.subr.msk.bf16.mxu1 %vm4728_vm13, %v1404_v28  ;;  %v1756_v7 = vld [vmem:[%s4480_s7 + $0x10] sm:$0xff]  ;;  %vm4733_vm14 = vmmov %vm4724_vm1 }
 0x5df   :  { %v1424_v53 = vsel %vm4730_vm6, %v1403_v40, 0  ;;  %1702 = vrot.lane.b32.xlu1 %v3852_v4, %s2691_s16  ;;  %2416 = vmatprep.subr.msk.bf16.mxu0 %vm4731_vm10, %v1402_v46  ;;  %vm4734_vm8 = vmmov %vm4724_vm1 }
 0x5e0   :  { %1875 = vmatpush1.bf16.msra.mxu0 %v1422_v16  ;;  %2021 = vmatpush1.bf16.msra.mxu1 %v1424_v53  ;;  %v1435_v6 = vpop.permute.xlu0 %1434 }
 0x5e1   :  { %v1431_v0 = vpop.permute.xlu1 %1430 }
 0x5e2   :  { %1708 = vrot.lane.b32.xlu0 %v3854_v15, %s2691_s16  ;;  %v1460_v30 = vsel %vm4735_vm12, %v1431_v0, %v1435_v6 }
 0x5e3   :  { %1706 = vrot.lane.b32.xlu1 %v3860_v13, %s2691_s16 }
 0x5e4   :  { %v1439_v61 = vpop.permute.xlu0 %1438 }
 0x5e5   :  { %v1437_v27 = vpop.permute.xlu1 %1436 }
 0x5e6   :  { %1789 = vperm.xlu0 %2561, %v1759_v47  }
 0x5e7   :  { %1784 = vperm.xlu1 %2562, %v1758_v31  }
 0x5e8   :  { %v3964_v23 = vpop.permute.xlu0 %1478 }
 0x5e9   :  { %v3969_v3 = vpop.permute.xlu1 %1474 }
 0x5ea   :  { %1799 = vperm.xlu0 %2561, %v1761_v43  }
 0x5eb   :  { %1794 = vperm.xlu1 %2562, %v1760_v33  }
 0x5ec   :  { %v1483_v19 = vpop.permute.xlu0 %1482 }
 0x5ed   :  { %v1481_v9 = vpop.permute.xlu1 %1480 }
 0x5ee   :  { %1769 = vperm.xlu0 %2561, %v1755_v41  }
 0x5ef   :  { %1764 = vperm.xlu1 %2562, %v1754_v11  }
 0x5f0   :  { %v3980_v59 = vpop.permute.xlu0 %1522 }
 0x5f1   :  { %v3985_v58 = vpop.permute.xlu1 %1518 }
 0x5f2   :  { %1779 = vperm.xlu0 %2561, %v1757_v5  }
 0x5f3   :  { %1774 = vperm.xlu1 %2562, %v1756_v7  }
 0x5f4   :  { %v3987_v62 = vpop.permute.xlu0 %1526 }
 0x5f5   :  { %v3989_v21 = vpop.permute.xlu1 %1524 }
 0x5f8   :  { %v3991_v28 = vpop.permute.xlu0 %1564 }
 0x5f9   :  { %v3993_v52 = vpop.permute.xlu1 %1562 }
 0x5fc   :  { %v3995_v46 = vpop.permute.xlu0 %1568 }
 0x5fd   :  { %v3997_v40 = vpop.permute.xlu1 %1566 }
 0x600   :  { %v3999_v16 = vpop.permute.xlu0 %1608 }
 0x601   :  { %v4001_v53 = vpop.permute.xlu1 %1606 }
 0x604   :  { %v4003_v47 = vpop.permute.xlu0 %1612 }
 0x605   :  { %v4005_v31 = vpop.permute.xlu1 %1610 }
 0x608   :  { %v1397_v43 = vpop.permute.xlu0 %1396 }
 0x609   :  { %v1383_v33 = vpop.permute.xlu1 %1382 }
 0x60a   :  { %v1420_v41 = vsel %vm4724_vm1, %v1383_v33, %v1397_v43  ;;  %vm4736_vm1 = vmmov %vm4735_vm12  ;;  %vm4739_vm12 = vnez %v4607_v39 }
 0x60b   :  { %v1426_v24 = vsel %vm4729_vm5, %v1420_v41, 0  ;;  %vm4741_vm5 = vnez %v4613_v17 }
 0x60c   :  { %v1401_v11 = vpop.permute.xlu0 %1400  ;;  %v1466_v54 = vsel %vm4741_vm5, %v1460_v30, 0 }
 0x60d   :  { %v1407_v5 = vsel %vm4732_vm11, %v1401_v11, %v1383_v33  ;;  %v1399_v7 = vpop.permute.xlu1 %1398  ;;  %v1448_v33 = vsel %vm4736_vm1, %v1439_v61, %v1431_v0  ;;  %vm4737_vm11 = vmmov %vm4736_vm1 }
 0x60e   :  { %v1405_v55 = vsel %vm4733_vm14, %v1397_v43, %v1399_v7  ;;  %v1406_v20 = vsel %vm4734_vm8, %v1399_v7, %v1401_v11  ;;  %2437 = vmatprep.subr.msk.bf16.mxu1 %vm4728_vm13, %v1407_v5  ;;  %v1446_v43 = vsel %vm4737_vm11, %v1435_v6, %v1437_v27  ;;  %vm4738_vm14 = vmmov %vm4736_vm1  ;;  %vm4740_vm13 = vnez %v4609_v49 }
 0x60f   :  { %v1428_v10 = vsel %vm4730_vm6, %v1406_v20, 0  ;;  %2417 = vmatprep.subr.msk.bf16.mxu0 %vm4731_vm10, %v1405_v55  ;;  %v1447_v11 = vsel %vm4738_vm14, %v1437_v27, %v1439_v61  ;;  %vm4742_vm6 = vnez %v4615_v50  ;;  %vm4743_vm10 = vmmov %vm4736_vm1  ;;  %vm4746_vm14 = vcmask 121856  }
 0x610   :  { %1877 = vmatpush1.bf16.msra.mxu0 %v1426_v24  ;;  %2023 = vmatpush1.bf16.msra.mxu1 %v1428_v10  ;;  %v1441_v51 = vpop.permute.xlu0 %1440  ;;  %v1468_v1 = vsel %vm4742_vm6, %v1447_v11, 0  ;;  %vm4744_vm8 = vmmov %vm4736_vm1  ;;  %v1504_v30 = vsel %vm4746_vm14, %v3969_v3, %v3964_v23 }
 0x611   :  { %2418 = vmatprep.subr.msk.bf16.mxu0 %vm4739_vm12, %v1446_v43  ;;  %2438 = vmatprep.subr.msk.bf16.mxu1 %vm4740_vm13, %v1448_v33  ;;  %v1433_v60 = vpop.permute.xlu1 %1432  ;;  %vm4745_vm11 = vmmov %vm4736_vm1 }
 0x612   :  { %v1464_v20 = vsel %vm4743_vm10, %v1433_v60, %v1441_v51  ;;  %vm4747_vm10 = vmmov %vm4746_vm14 }
 0x613   :  { %v1470_v61 = vsel %vm4741_vm5, %v1464_v20, 0  ;;  %v1492_v41 = vsel %vm4747_vm10, %v1483_v19, %v3969_v3  ;;  %vm4751_vm5 = vnez %v4631_v42 }
 0x614   :  { %1879 = vmatpush1.bf16.msra.mxu0 %v1466_v54  ;;  %2025 = vmatpush1.bf16.msra.mxu1 %v1468_v1  ;;  %v1445_v24 = vpop.permute.xlu0 %1444 }
 0x615   :  { %v1451_v10 = vsel %vm4744_vm8, %v1445_v24, %v1433_v60  ;;  %v1443_v55 = vpop.permute.xlu1 %1442  ;;  %vm4748_vm8 = vmmov %vm4747_vm10 }
 0x616   :  { %v1449_v6 = vsel %vm4736_vm1, %v1441_v51, %v1443_v55  ;;  %v1450_v0 = vsel %vm4745_vm11, %v1443_v55, %v1445_v24  ;;  %2439 = vmatprep.subr.msk.bf16.mxu1 %vm4740_vm13, %v1451_v10  ;;  %v1490_v49 = vsel %vm4748_vm8, %v3964_v23, %v1481_v9  ;;  %vm4749_vm13 = vmmov %vm4748_vm8  ;;  %vm4750_vm1 = vnez %v4633_v45 }
 0x617   :  { %v1472_v27 = vsel %vm4742_vm6, %v1450_v0, 0  ;;  %2419 = vmatprep.subr.msk.bf16.mxu0 %vm4739_vm12, %v1449_v6  ;;  %v1491_v5 = vsel %vm4749_vm13, %v1481_v9, %v1483_v19  ;;  %vm4752_vm12 = vnez %v4635_v34  ;;  %vm4753_vm6 = vnez %v4637_v35  ;;  %vm4754_vm11 = vmmov %vm4748_vm8 }
 0x618   :  { %1881 = vmatpush1.bf16.msra.mxu0 %v1470_v61  ;;  %2027 = vmatpush1.bf16.msra.mxu1 %v1472_v27  ;;  %v1485_v7 = vpop.permute.xlu0 %1484  ;;  %v1510_v39 = vsel %vm4752_vm12, %v1504_v30, 0  ;;  %v1512_v50 = vsel %vm4753_vm6, %v1491_v5, 0  ;;  %vm4755_vm14 = vmmov %vm4748_vm8  ;;  %vm4757_vm13 = vcmask 7168  }
 0x619   :  { %2420 = vmatprep.subr.msk.bf16.mxu0 %vm4750_vm1, %v1490_v49  ;;  %2440 = vmatprep.subr.msk.bf16.mxu1 %vm4751_vm5, %v1492_v41  ;;  %v1477_v17 = vpop.permute.xlu1 %1476  ;;  %vm4756_vm10 = vmmov %vm4748_vm8  ;;  %v1548_v11 = vsel %vm4757_vm13, %v3985_v58, %v3980_v59 }
 0x61a   :  { %v1508_v23 = vsel %vm4754_vm11, %v1477_v17, %v1485_v7  ;;  %vm4758_vm11 = vmmov %vm4757_vm13 }
 0x61b   :  { %v1514_v51 = vsel %vm4752_vm12, %v1508_v23, 0  ;;  %v1536_v54 = vsel %vm4758_vm11, %v3987_v62, %v3985_v58  ;;  %vm4761_vm12 = vnez %v4643_v38 }
 0x61c   :  { %1883 = vmatpush1.bf16.msra.mxu0 %v1510_v39  ;;  %2029 = vmatpush1.bf16.msra.mxu1 %v1512_v50  ;;  %v1489_v3 = vpop.permute.xlu0 %1488 }
 0x61d   :  { %v1495_v19 = vsel %vm4755_vm14, %v1489_v3, %v1477_v17  ;;  %v1487_v9 = vpop.permute.xlu1 %1486 }
 0x61e   :  { %v1493_v33 = vsel %vm4756_vm10, %v1485_v7, %v1487_v9  ;;  %v1494_v43 = vsel %vm4748_vm8, %v1487_v9, %v1489_v3  ;;  %2441 = vmatprep.subr.msk.bf16.mxu1 %vm4751_vm5, %v1495_v19  ;;  %vm4759_vm5 = vmmov %vm4758_vm11  ;;  %vm4764_vm10 = vnez %v4647_v18 }
 0x61f   :  { %v1516_v60 = vsel %vm4753_vm6, %v1494_v43, 0  ;;  %2421 = vmatprep.subr.msk.bf16.mxu0 %vm4750_vm1, %v1493_v33  ;;  %v1534_v42 = vsel %vm4759_vm5, %v3980_v59, %v3989_v21  ;;  %vm4760_vm14 = vmmov %vm4759_vm5  ;;  %vm4762_vm1 = vnez %v4641_v37  ;;  %vm4763_vm6 = vnez %v4645_v25 }
 0x620   :  { %v1535_v1 = vsel %vm4760_vm14, %v3989_v21, %v3987_v62  ;;  %1885 = vmatpush1.bf16.msra.mxu0 %v1514_v51  ;;  %2031 = vmatpush1.bf16.msra.mxu1 %v1516_v60  ;;  %v1529_v34 = vpop.permute.xlu0 %1528  ;;  %v1554_v35 = vsel %vm4763_vm6, %v1548_v11, 0  ;;  %vm4765_vm8 = vmmov %vm4759_vm5  ;;  %vm4768_vm14 = vcmask 1039360  }
 0x621   :  { %2422 = vmatprep.subr.msk.bf16.mxu0 %vm4761_vm12, %v1534_v42  ;;  %2442 = vmatprep.subr.msk.bf16.mxu1 %vm4762_vm1, %v1536_v54  ;;  %v1521_v45 = vpop.permute.xlu1 %1520  ;;  %v1556_v59 = vsel %vm4764_vm10, %v1535_v1, 0  ;;  %vm4766_vm13 = vmmov %vm4759_vm5  ;;  %v1578_v38 = vsel %vm4768_vm14, %v3993_v52, %v3991_v28 }
 0x622   :  { %v1552_v58 = vsel %vm4765_vm8, %v1521_v45, %v1529_v34  ;;  %vm4767_vm11 = vmmov %vm4759_vm5  ;;  %vm4773_vm8 = vnez %v4655_v57 }
 0x623   :  { %v1558_v55 = vsel %vm4763_vm6, %v1552_v58, 0  ;;  %v2571_v58 = vld [vmem:[%s4479_s6] ss:$12 sps:$4 sm:$0xff]  }
 0x624   :  { %1887 = vmatpush1.bf16.msra.mxu0 %v1554_v35  ;;  %2033 = vmatpush1.bf16.msra.mxu1 %v1556_v59  ;;  %v1533_v62 = vpop.permute.xlu0 %1532 }
 0x625   :  { %v1539_v21 = vsel %vm4766_vm13, %v1533_v62, %v1521_v45  ;;  %v1531_v20 = vpop.permute.xlu1 %1530  ;;  %vm4774_vm13 = vnez %v4661_v8 }
 0x626   :  { %v1537_v24 = vsel %vm4767_vm11, %v1529_v34, %v1531_v20  ;;  %v1538_v10 = vsel %vm4759_vm5, %v1531_v20, %v1533_v62  ;;  %2443 = vmatprep.subr.msk.bf16.mxu1 %vm4762_vm1, %v1539_v21  ;;  %vm4775_vm11 = vnez %v4669_v2  ;;  %v2574_v21 = vld [vmem:[%s4479_s6 + $0x1c] ss:$12 sps:$4 sm:$0xff]  }
 0x627   :  { %v1560_v6 = vsel %vm4764_vm10, %v1538_v10, 0  ;;  %2423 = vmatprep.subr.msk.bf16.mxu0 %vm4761_vm12, %v1537_v24  ;;  %vm4769_vm12 = vmmov %vm4768_vm14  ;;  %vm4772_vm10 = vnez %v4653_v44 }
 0x628   :  { %1889 = vmatpush1.bf16.msra.mxu0 %v1558_v55  ;;  %2035 = vmatpush1.bf16.msra.mxu1 %v1560_v6  ;;  %v1653_v0 = vpop.permute.xlu0 %1652  ;;  %v1592_v18 = vsel %vm4769_vm12, %v3995_v46, %v3993_v52  ;;  %vm4770_vm1 = vmmov %vm4769_vm12 }
 0x629   :  { %1890 = vmatprep.subr.bf16.mxu0 %v3798_v63  ;;  %2036 = vmatprep.subr.bf16.mxu1 %v3789_v56  ;;  %v1651_v30 = vpop.permute.xlu1 %1650  ;;  %vm4771_vm6 = vmmov %vm4770_vm1 }
 0x62a   :  { %v1580_v56 = vsel %vm4771_vm6, %v3997_v40, %v3995_v46  ;;  %vm4776_vm5 = vmmov %vm4770_vm1  ;;  %vm4779_vm6 = vcmask 924672  }
 0x62b   :  { %vm4777_vm14 = vmmov %vm4770_vm1  ;;  %v1622_v61 = vsel %vm4779_vm6, %v4001_v53, %v3999_v16 }
 0x62c   :  { %1891 = vmatpush1.bf16.msra.mxu0 %v3787_v12  ;;  %2037 = vmatpush1.bf16.msra.mxu1 %v3796_v29  ;;  %v1657_v37 = vpop.permute.xlu0 %1656  ;;  %v1579_v12 = vsel %vm4770_vm1, %v3991_v28, %v3997_v40  ;;  %vm4778_vm12 = vmmov %vm4770_vm1  ;;  %v1642_v2 = vsel %vm3509_vm7, %v1622_v61, 0 }
 0x62d   :  { %1892 = vmatprep.subr.bf16.mxu0 %v3862_v26  ;;  %2038 = vmatprep.subr.bf16.mxu1 %v3854_v15  ;;  %v1655_v25 = vpop.permute.xlu1 %1654  ;;  %v1598_v15 = vsel %vm4774_vm13, %v1578_v38, 0  ;;  %v1600_v26 = vsel %vm4775_vm11, %v1580_v56, 0  ;;  %v4807_v38 = vld [vmem:[#allocation7_spill] sm:$0xff]  ;;  %v2576_v56 = vld [vmem:[%s4479_s6 + $0x18] ss:$12 sps:$4 sm:$0xff]  }
 0x630   :  { %1893 = vmatpush1.bf16.msra.mxu0 %v3852_v4  ;;  %2039 = vmatpush1.bf16.msra.mxu1 %v3860_v13  ;;  %v1573_v29 = vpop.permute.xlu0 %1572 }
 0x631   :  { %2424 = vmatprep.subr.msk.bf16.mxu0 %vm4772_vm10, %v1579_v12  ;;  %2444 = vmatprep.subr.msk.bf16.mxu1 %vm4773_vm8, %v1592_v18  ;;  %v1571_v63 = vpop.permute.xlu1 %1570  ;;  %v4809_v12 = vld [vmem:[#allocation8_spill] sm:$0xff] }
 0x632   :  { %v1581_v28 = vsel %vm4776_vm5, %v1571_v63, %v1573_v29  ;;  %vm4780_vm5 = vmmov %vm4779_vm6  ;;  %vm4788_vm6 = vcmask 916480  }
 0x633   :  { %v1602_v27 = vsel %vm4774_vm13, %v1581_v28, 0  ;;  %v1636_v49 = vsel %vm4780_vm5, %v4003_v47, %v4001_v53  ;;  %vm4784_vm13 = vmmov %vm4780_vm5  ;;  %v1666_v50 = vsel %vm4788_vm6, %v1651_v30, %v1653_v0 }
 0x634   :  { %1895 = vmatpush1.bf16.msra.mxu0 %v1598_v15  ;;  %2041 = vmatpush1.bf16.msra.mxu1 %v1600_v26  ;;  %v1577_v4 = vpop.permute.xlu0 %1576  ;;  %v1686_v22 = vsel %vm3563_vm3, %v1666_v50, 0 }
 0x635   :  { %v1596_v13 = vsel %vm4777_vm14, %v1577_v4, %v1571_v63  ;;  %v1575_v52 = vpop.permute.xlu1 %1574  ;;  %vm4782_vm14 = vmmov %vm4780_vm5  ;;  %v2577_v63 = vld [vmem:[%s4479_s6 + $0x34] ss:$12 sps:$4 sm:$0xff]  }
 0x636   :  { %v1582_v46 = vsel %vm4778_vm12, %v1573_v29, %v1575_v52  ;;  %v1583_v40 = vsel %vm4770_vm1, %v1575_v52, %v1577_v4  ;;  %2445 = vmatprep.subr.msk.bf16.mxu1 %vm4773_vm8, %v1596_v13  ;;  %vm4781_vm8 = vmmov %vm4780_vm5  ;;  %v1624_v5 = vsel %vm4782_vm14, %v4005_v31, %v4003_v47 }
 0x637   :  { %v1604_v41 = vsel %vm4775_vm11, %v1583_v40, 0  ;;  %2425 = vmatprep.subr.msk.bf16.mxu0 %vm4772_vm10, %v1582_v46  ;;  %v1623_v57 = vsel %vm4781_vm8, %v3999_v16, %v4005_v31  ;;  %vm4783_vm10 = vnez %v4684_v48  ;;  %vm4785_vm11 = vmmov %vm4780_vm5 }
 0x638   :  { %1897 = vmatpush1.bf16.msra.mxu0 %v1602_v27  ;;  %2043 = vmatpush1.bf16.msra.mxu1 %v1604_v41  ;;  %v1617_v8 = vpop.permute.xlu0 %1616  ;;  %v1644_v16 = vsel %vm4783_vm10, %v1624_v5, 0  ;;  %vm4786_vm12 = vmmov %vm4780_vm5  ;;  %v2579_v27 = vld [vmem:[%s4479_s6 + $0x30] ss:$12 sps:$4 sm:$0xff]   ;;  %v2580_v41 = vld [vmem:[%s4479_s6 + $0x4c] ss:$12 sps:$4 sm:$0xff]  }
 0x639   :  { %2426 = vmatprep.subr.msk.bf16.mxu0 %vm3504_vm2, %v1623_v57  ;;  %2446 = vmatprep.subr.msk.bf16.mxu1 %vm3500_vm15, %v1636_v49  ;;  %v1615_v44 = vpop.permute.xlu1 %1614  ;;  %vm4787_vm1 = vmmov %vm4780_vm5  ;;  %v2582_v49 = vld [vmem:[%s4479_s6 + $0x48] ss:$12 sps:$4 sm:$0xff]   ;;  %v4815_v57 = vmov 0  }
 0x63a   :  { %v1625_v53 = vsel %vm4784_vm13, %v1615_v44, %v1617_v8  ;;  %vm4789_vm5 = vmmov %vm4788_vm6  ;;  %v2583_v5 = vld [vmem:[%s4479_s6 + $0x8] ss:$12 sps:$4 sm:$0xff]  }
 0x63b   :  { %v1646_v23 = vsel %vm3509_vm7, %v1625_v53, 0  ;;  %v1680_v19 = vsel %vm4789_vm5, %v1657_v37, %v1651_v30  ;;  %vm4790_vm8 = vmmov %vm4789_vm5  ;;  %v4803_v30 = vld [vmem:[#allocation5_spill] sm:$0xff] }
 0x63c   :  { %1899 = vmatpush1.bf16.msra.mxu0 %v1642_v2  ;;  %2045 = vmatpush1.bf16.msra.mxu1 %v1644_v16  ;;  %v1621_v47 = vpop.permute.xlu0 %1620  ;;  %v1667_v9 = vsel %vm4790_vm8, %v1653_v0, %v1655_v25  ;;  %vm4791_vm14 = vmmov %vm4789_vm5  ;;  %vm4804_vm13 = vnez %v4803_v30  ;;  %v2586_v2 = vld [vmem:[%s4479_s6 + $0x50] ss:$12 sps:$4 sm:$0xff]  }
 0x63d   :  { %v1640_v31 = vsel %vm4785_vm11, %v1621_v47, %v1615_v44  ;;  %v1619_v7 = vpop.permute.xlu1 %1618  ;;  %v1668_v33 = vsel %vm4791_vm14, %v1655_v25, %v1657_v37  ;;  %v4805_v37 = vld [vmem:[#allocation6_spill] sm:$0xff] }
 0x63e   :  { %v1626_v17 = vsel %vm4786_vm12, %v1617_v8, %v1619_v7  ;;  %v1627_v39 = vsel %vm4787_vm1, %v1619_v7, %v1621_v47  ;;  %2447 = vmatprep.subr.msk.bf16.mxu1 %vm3500_vm15, %v1640_v31  ;;  %v1688_v51 = vsel %vm3567_vm9, %v1668_v33, 0  ;;  %vm4795_vm15 = vmmov %vm4789_vm5  ;;  %vm4806_vm11 = vnez %v4805_v37  ;;  %v2584_v8 = vld [vmem:[%s4479_s6 + $0x20] ss:$12 sps:$4 sm:$0xff]   ;;  %v2585_v44 = vld [vmem:[%s4479_s6 + $0x38] ss:$12 sps:$4 sm:$0xff]  }
 0x63f   :  { %v1648_v3 = vsel %vm4783_vm10, %v1627_v39, 0  ;;  %2427 = vmatprep.subr.msk.bf16.mxu0 %vm3504_vm2, %v1626_v17  ;;  %vm4796_vm2 = vmmov %vm4789_vm5  ;;  %vm4808_vm12 = vnez %v4807_v38  ;;  %vm4810_vm1 = vnez %v4809_v12 }
 0x640   :  { %1901 = vmatpush1.bf16.msra.mxu0 %v1646_v23  ;;  %2047 = vmatpush1.bf16.msra.mxu1 %v1648_v3  ;;  %v1661_v14 = vpop.permute.xlu0 %1660  ;;  %vm4797_vm7 = vmmov %vm4796_vm2 }
 0x641   :  { %2428 = vmatprep.subr.msk.bf16.mxu0 %vm3558_vm0, %v1667_v9  ;;  %2448 = vmatprep.subr.msk.bf16.mxu1 %vm3554_vm4, %v1680_v19  ;;  %v1659_v48 = vpop.permute.xlu1 %1658  ;;  %vm4798_vm10 = vmmov %vm4796_vm2 }
 0x642   :  { %v1669_v60 = vsel %vm4795_vm15, %v1659_v48, %v1661_v14  ;;  %vm4816_vm15 = vcmask 261120  }
 0x643   :  { %v1690_v35 = vsel %vm3563_vm3, %v1669_v60, 0 }
 0x644   :  { %1903 = vmatpush1.bf16.msra.mxu0 %v1686_v22  ;;  %2049 = vmatpush1.bf16.msra.mxu1 %v1688_v51  ;;  %v1665_v54 = vpop.permute.xlu0 %1664 }
 0x645   :  { %v1684_v42 = vsel %vm4796_vm2, %v1665_v54, %v1659_v48  ;;  %v1663_v1 = vpop.permute.xlu1 %1662  ;;  %vm4817_vm2 = vmmov %vm4816_vm15 }
 0x646   :  { %v1670_v34 = vsel %vm4797_vm7, %v1661_v14, %v1663_v1  ;;  %v1671_v45 = vsel %vm4798_vm10, %v1663_v1, %v1665_v54  ;;  %2449 = vmatprep.subr.msk.bf16.mxu1 %vm3554_vm4, %v1684_v42  ;;  %vm4799_vm4 = vcmask 908288   ;;  %vm4818_vm7 = vmmov %vm4817_vm2 }
 0x647   :  { %v1692_v59 = vsel %vm3567_vm9, %v1671_v45, 0  ;;  %2429 = vmatprep.subr.msk.bf16.mxu0 %vm3558_vm0, %v1670_v34  ;;  %vm4800_vm0 = vmmov %vm4799_vm4 }
 0x648   :  { %1905 = vmatpush1.bf16.msra.mxu0 %v1690_v35  ;;  %2051 = vmatpush1.bf16.msra.mxu1 %v1692_v59  ;;  %v1697_v62 = vpop.permute.xlu0 %1696  ;;  %vm4801_vm3 = vmmov %vm4800_vm0 }
 0x649   :  { %v1695_v20 = vpop.permute.xlu1 %1694  ;;  %vm4802_vm9 = vmmov %vm4800_vm0 }
 0x64a   :  { %v1710_v24 = vsel %vm4799_vm4, %v1695_v20, %v1697_v62  ;;  %vm4811_vm6 = vmmov %vm4800_vm0 }
 0x64b   :  { %1907 = vmatmul.mubr.bf16.vlgmr.msra.gmra.mrb[8].mxu0 %v2571_v58  ;;  %2053 = vmatmul.mubr.bf16.vlgmr.msra.gmra.mrb[8].mxu1 %v2571_v58  ;;  %v1730_v25 = vsel %vm4806_vm11, %v1710_v24, 0  ;;  %vm4812_vm5 = vmmov %vm4800_vm0 }
 0x64c   :  { %v1701_v10 = vpop.permute.xlu0 %1700  ;;  %1916 = vmatprep.mubr.bf16.mxu0 %v2574_v21  ;;  %2062 = vmatprep.mubr.bf16.mxu1 %v2574_v21  ;;  %vm4813_vm8 = vmmov %vm4800_vm0 }
 0x64d   :  { %v1724_v32 = vsel %vm4800_vm0, %v1701_v10, %v1695_v20  ;;  %v1699_v55 = vpop.permute.xlu1 %1698  ;;  %vm4814_vm14 = vmmov %vm4800_vm0 }
 0x64e   :  { %v1711_v6 = vsel %vm4801_vm3, %v1697_v62, %v1699_v55  ;;  %v1712_v0 = vsel %vm4802_vm9, %v1699_v55, %v1701_v10  ;;  %2450 = vmatprep.subr.msk.bf16.mxu1 %vm4804_vm13, %v1724_v32  ;;  %vm4819_vm10 = vmmov %vm4817_vm2 }
 0x64f   :  { %v1732_v18 = vsel %vm4808_vm12, %v1712_v0, 0  ;;  %2430 = vmatprep.subr.msk.bf16.mxu0 %vm4810_vm1, %v1711_v6  ;;  %vm4820_vm4 = vmmov %vm4817_vm2 }
 0x650   :  { %1948 = vmatpush1.bf16.msra.mxu0 %v1730_v25  ;;  %2094 = vmatpush1.bf16.msra.mxu1 %v1732_v18  ;;  %v1705_v29 = vpop.permute.xlu0 %1704  ;;  %vm4821_vm0 = vmmov %vm4817_vm2 }
 0x651   :  { %v1703_v15 = vpop.permute.xlu1 %1702  ;;  %vm4822_vm3 = vmmov %vm4821_vm0 }
 0x652   :  { %v1713_v26 = vsel %vm4811_vm6, %v1703_v15, %v1705_v29  ;;  %vm4823_vm9 = vmmov %vm4821_vm0 }
 0x653   :  { %1917 = vmatmul.mubr.bf16.gmra.mrb[12].mxu0 %v2576_v56  ;;  %2063 = vmatmul.mubr.bf16.gmra.mrb[12].mxu1 %v2576_v56  ;;  %v1734_v40 = vsel %vm4806_vm11, %v1713_v26, 0 }
 0x654   :  { %v1709_v28 = vpop.permute.xlu0 %1708  ;;  %1926 = vmatprep.mubr.bf16.mxu0 %v2577_v63  ;;  %2072 = vmatprep.mubr.bf16.mxu1 %v2577_v63 }
 0x655   :  { %v1728_v4 = vsel %vm4812_vm5, %v1709_v28, %v1703_v15  ;;  %v1707_v13 = vpop.permute.xlu1 %1706 }
 0x656   :  { %v1714_v52 = vsel %vm4813_vm8, %v1705_v29, %v1707_v13  ;;  %v1715_v46 = vsel %vm4814_vm14, %v1707_v13, %v1709_v28  ;;  %2451 = vmatprep.subr.msk.bf16.mxu1 %vm4804_vm13, %v1728_v4 }
 0x657   :  { %v1736_v61 = vsel %vm4808_vm12, %v1715_v46, 0  ;;  %2431 = vmatprep.subr.msk.bf16.mxu0 %vm4810_vm1, %v1714_v52 }
 0x658   :  { %1950 = vmatpush1.bf16.msra.mxu0 %v1734_v40  ;;  %2096 = vmatpush1.bf16.msra.mxu1 %v1736_v61 }
 0x65b   :  { %1927 = vmatmul.mubr.bf16.gmra.mrb[16].mxu0 %v2579_v27  ;;  %2073 = vmatmul.mubr.bf16.gmra.mrb[16].mxu1 %v2579_v27 }
 0x65c   :  { %1936 = vmatprep.mubr.bf16.mxu0 %v2580_v41  ;;  %2082 = vmatprep.mubr.bf16.mxu1 %v2580_v41 }
 0x663   :  { %1937 = vmatmul.mubr.bf16.gmra.mrb[20].mxu0 %v2582_v49  ;;  %2083 = vmatmul.mubr.bf16.gmra.mrb[20].mxu1 %v2582_v49 }
 0x664   :  { %1979 = vmatprep.mubr.bf16.mxu0 %v4815_v57  ;;  %2125 = vmatprep.mubr.bf16.mxu1 %v4815_v57 }
 0x665   :  { %v1790_v22 = vpop.permute.xlu0 %1789 }
 0x666   :  { %v1785_v23 = vpop.permute.xlu1 %1784 }
 0x669   :  { %v4298_v37 = vpop.permute.xlu0 %1799 }
 0x66a   :  { %v1795_v11 = vpop.permute.xlu1 %1794 }
 0x66b   :  { %2432 = vmatmul.mubr.msk.bf16.vlgmr.msra.gmra.mrb[8].mxu0 %vm4816_vm15, %v2583_v5  ;;  %2452 = vmatmul.mubr.msk.bf16.vlgmr.msra.gmra.mrb[8].mxu1 %vm4817_vm2, %v2583_v5 }
 0x66c   :  { %1989 = vmatprep.mubr.bf16.mxu0 %v4815_v57  ;;  %2135 = vmatprep.mubr.bf16.mxu1 %v4815_v57 }
 0x66e   :  { %v1765_v25 = vpop.permute.xlu1 %1764 }
 0x673   :  { %2433 = vmatmul.mubr.msk.bf16.gmra.mrb[12].mxu0 %vm4818_vm7, %v2584_v8  ;;  %2453 = vmatmul.mubr.msk.bf16.gmra.mrb[12].mxu1 %vm4819_vm10, %v2584_v8 }
 0x674   :  { %1999 = vmatprep.mubr.bf16.mxu0 %v4815_v57  ;;  %2145 = vmatprep.mubr.bf16.mxu1 %v4815_v57 }
 0x67b   :  { %2434 = vmatmul.mubr.msk.bf16.gmra.mrb[16].mxu0 %vm4820_vm4, %v2585_v44  ;;  %2454 = vmatmul.mubr.msk.bf16.gmra.mrb[16].mxu1 %vm4821_vm0, %v2585_v44 }
 0x67c   :  { %2009 = vmatprep.mubr.bf16.mxu0 %v4815_v57  ;;  %2155 = vmatprep.mubr.bf16.mxu1 %v4815_v57 }
 0x683   :  { %2435 = vmatmul.mubr.msk.bf16.gmra.mrb[20].mxu0 %vm4822_vm3, %v2586_v2  ;;  %2455 = vmatmul.mubr.msk.bf16.gmra.mrb[20].mxu1 %vm4823_vm9, %v2586_v2 }
 0x73e   :  { %v1981_v16 = vpop.f32.mrb[8].mxu0  ;;  %v2127_v53 = vpop.f32.mrb[8].mxu1 }
 0x73f   :  { %v1983_v47 = vpop.f32.mrb[9].mxu0  ;;  %v4272_v31 = vpop.f32.mrb[9].mxu1  ;;  %v2472_v18 = vadd.f32 %v1981_v16, %v1765_v25  ;;  %v2488_v12 = vadd.f32 %v2127_v53, %v1765_v25 }
 0x740   :  { %v4274_v7 = vpop.f32.mrb[10].mxu0  ;;  %v4276_v17 = vpop.f32.mrb[10].mxu1  ;;  %v2473_v41 = vadd.f32 %v1983_v47, %v1765_v25  ;;  %v2489_v44 = vadd.f32 %v4272_v31, %v1765_v25 }
 0x741   :  { %v4278_v39 = vpop.f32.mrb[11].mxu0  ;;  %v4280_v50 = vpop.f32.mrb[11].mxu1  ;;  %v2182_v16 = vmul.f32 0.01, %v2472_v18  ;;  %vm2166_vm13 = vcmp.gt.f32.partialorder %v2472_v18, 0.0  ;;  %vm2168_vm11 = vcmp.gt.f32.partialorder %v2488_v12, 0.0 }
 0x742   :  { %v2183_v47 = vmul.f32 0.01, %v2473_v41  ;;  %vm2167_vm12 = vcmp.gt.f32.partialorder %v2473_v41, 0.0  ;;  %vm2169_vm1 = vcmp.gt.f32.partialorder %v2489_v44, 0.0 }
 0x746   :  { %v4282_v3 = vpop.f32.mrb[12].mxu0  ;;  %v4284_v19 = vpop.f32.mrb[12].mxu1 }
 0x747   :  { %v4286_v9 = vpop.f32.mrb[13].mxu0  ;;  %v4288_v33 = vpop.f32.mrb[13].mxu1 }
 0x748   :  { %v4290_v14 = vpop.f32.mrb[14].mxu0  ;;  %v4292_v36 = vpop.f32.mrb[14].mxu1 }
 0x749   :  { %v4294_v48 = vpop.f32.mrb[15].mxu0  ;;  %v4296_v43 = vpop.f32.mrb[15].mxu1 }
 0x74e   :  { %v2001_v51 = vpop.f32.mrb[16].mxu0  ;;  %v2147_v60 = vpop.f32.mrb[16].mxu1 }
 0x74f   :  { %v2480_v54 = vadd.f32 %v2001_v51, %v1785_v23  ;;  %v2496_v42 = vadd.f32 %v2147_v60, %v1785_v23  ;;  %v2003_v1 = vpop.f32.mrb[17].mxu0  ;;  %v2149_v34 = vpop.f32.mrb[17].mxu1  ;;  %v2185_v60 = vmul.f32 0.01, %v2489_v44 }
 0x750   :  { %v2481_v45 = vadd.f32 %v2003_v1, %v1785_v23  ;;  %v2497_v35 = vadd.f32 %v2149_v34, %v1785_v23  ;;  %v2005_v59 = vpop.f32.mrb[18].mxu0  ;;  %v2151_v58 = vpop.f32.mrb[18].mxu1  ;;  %v2184_v23 = vmul.f32 0.01, %v2488_v12 }
 0x751   :  { %v2456_v62 = vmul.f32 -1.442695, %v2480_v54  ;;  %v2458_v21 = vmul.f32 -1.442695, %v2496_v42  ;;  %v2482_v20 = vadd.f32 %v2005_v59, %v1790_v22  ;;  %v2498_v24 = vadd.f32 %v2151_v58, %v1790_v22  ;;  %v2007_v10 = vpop.f32.mrb[19].mxu0  ;;  %v2153_v32 = vpop.f32.mrb[19].mxu1 }
 0x752   :  { %v2457_v55 = vmul.f32 -1.442695, %v2481_v45  ;;  %v2459_v6 = vmul.f32 -1.442695, %v2497_v35  ;;  %v2483_v0 = vadd.f32 %v2007_v10, %v1790_v22  ;;  %v2499_v30 = vadd.f32 %v2153_v32, %v1790_v22  ;;  %v1770_v51 = vpop.permute.xlu0 %1769 }
 0x753   :  { %2603 = vpow2.f32 %v2456_v62  ;;  %v2460_v38 = vmul.f32 -1.442695, %v2482_v20  ;;  %v2462_v56 = vmul.f32 -1.442695, %v2498_v24  ;;  %v4308_v42 = vsel %vm2166_vm13, %v2472_v18, %v2182_v16 }
 0x754   :  { %2605 = vpow2.f32 %v2458_v21  ;;  %v2461_v15 = vmul.f32 -1.442695, %v2483_v0  ;;  %v2463_v52 = vmul.f32 -1.442695, %v2499_v30  ;;  %v2474_v31 = vadd.f32 %v4274_v7, %v1770_v51 }
 0x755   :  { %2607 = vpow2.f32 %v2457_v55  ;;  %v4311_v34 = vsel %vm2168_vm11, %v2488_v12, %v2184_v23  ;;  %v2490_v45 = vadd.f32 %v4276_v17, %v1770_v51  ;;  %v4314_v58 = vsel %vm2167_vm12, %v2473_v41, %v2183_v47 }
 0x756   :  { %v2011_v29 = vpop.f32.mrb[20].mxu0  ;;  %v2157_v63 = vpop.f32.mrb[20].mxu1  ;;  %2609 = vpow2.f32 %v2459_v6  ;;  %v2475_v62 = vadd.f32 %v4278_v39, %v1770_v51  ;;  %v4317_v24 = vsel %vm2169_vm1, %v2489_v44, %v2185_v60  ;;  %v2491_v7 = vadd.f32 %v4280_v50, %v1770_v51 }
 0x757   :  { %v2484_v26 = vadd.f32 %v2011_v29, %v1795_v11  ;;  %v2500_v28 = vadd.f32 %v2157_v63, %v1795_v11  ;;  %v2013_v4 = vpop.f32.mrb[21].mxu0  ;;  %v2159_v13 = vpop.f32.mrb[21].mxu1  ;;  %2611 = vpow2.f32 %v2460_v38  ;;  %vm2170_vm6 = vcmp.gt.f32.partialorder %v2474_v31, 0.0 }
 0x758   :  { %v2485_v46 = vadd.f32 %v2013_v4, %v1795_v11  ;;  %v2501_v40 = vadd.f32 %v2159_v13, %v1795_v11  ;;  %v2015_v61 = vpop.f32.mrb[22].mxu0  ;;  %v4300_v27 = vpop.f32.mrb[22].mxu1  ;;  %2613 = vpow2.f32 %v2462_v56  ;;  %v2186_v55 = vmul.f32 0.01, %v2474_v31 }
 0x759   :  { %v2464_v49 = vmul.f32 -1.442695, %v2484_v26  ;;  %v2486_v57 = vadd.f32 %v2015_v61, %v4298_v37  ;;  %v4303_v5 = vpop.f32.mrb[23].mxu0  ;;  %v4305_v8 = vpop.f32.mrb[23].mxu1  ;;  %v2466_v2 = vmul.f32 -1.442695, %v2500_v28  ;;  %2615 = vpow2.f32 %v2461_v15 }
 0x75a   :  { %v2465_v53 = vmul.f32 -1.442695, %v2485_v46  ;;  %2617 = vpow2.f32 %v2463_v52  ;;  %v2467_v22 = vmul.f32 -1.442695, %v2501_v40  ;;  %vm2172_vm5 = vcmp.gt.f32.partialorder %v2490_v45, 0.0  ;;  %v1775_v46 = vpop.permute.xlu1 %1774 }
 0x75b   :  { %2619 = vpow2.f32 %v2464_v49  ;;  %v2468_v11 = vmul.f32 -1.442695, %v2486_v57  ;;  %v2188_v0 = vmul.f32 0.01, %v2490_v45  ;;  %vm2171_vm8 = vcmp.gt.f32.partialorder %v2475_v62, 0.0 }
 0x75c   :  { %2621 = vpow2.f32 %v2466_v2  ;;  %v2187_v25 = vmul.f32 0.01, %v2475_v62  ;;  %vm2173_vm14 = vcmp.gt.f32.partialorder %v2491_v7, 0.0  ;;  %v2189_v50 = vmul.f32 0.01, %v2491_v7 }
 0x75d   :  { %v2604_v54 = vpop.eup %2603  ;;  %2623 = vpow2.f32 %v2465_v53  ;;  %v2202_v29 = vsel %vm2170_vm6, %v2474_v31, %v2186_v55  ;;  %v2502_v15 = vadd.f32 %v4300_v27, %v4298_v37  ;;  %v2204_v28 = vsel %vm2172_vm5, %v2490_v45, %v2188_v0 }
 0x75e   :  { %v2606_v1 = vpop.eup %2605  ;;  %v2262_v35 = vadd.f32 1.0, %v2604_v54  ;;  %2625 = vpow2.f32 %v2467_v22  ;;  %v2487_v13 = vadd.f32 %v4303_v5, %v4298_v37  ;;  %v4327_v40 = vsel %vm2171_vm8, %v2475_v62, %v2187_v25 }
 0x75f   :  { %v2608_v59 = vpop.eup %2607  ;;  %v2264_v21 = vadd.f32 1.0, %v2606_v1  ;;  %2627 = vpow2.f32 %v2468_v11  ;;  %v2503_v41 = vadd.f32 %v4305_v8, %v4298_v37  ;;  %v4332_v27 = vsel %vm2173_vm14, %v2491_v7, %v2189_v50 }
 0x760   :  { %v2610_v20 = vpop.eup %2609  ;;  %2629 = vrcp.f32 %v2262_v35  ;;  %v2263_v10 = vadd.f32 1.0, %v2608_v59  ;;  %v2476_v57 = vadd.f32 %v4282_v3, %v1775_v46  ;;  %v4336_v5 = vadd.f32 %v4284_v19, %v1775_v46 }
 0x761   :  { %v2612_v32 = vpop.eup %2611  ;;  %2631 = vrcp.f32 %v2264_v21  ;;  %v2265_v17 = vadd.f32 1.0, %v2610_v20  ;;  %v2470_v53 = vmul.f32 -1.442695, %v2502_v15  ;;  %v4339_v22 = vadd.f32 %v4286_v9, %v1775_v46  ;;  %v4346_v9 = vpop.permute.xlu0 %1779 }
 0x762   :  { %v2614_v6 = vpop.eup %2613  ;;  %2633 = vrcp.f32 %v2263_v10  ;;  %v2266_v30 = vadd.f32 1.0, %v2612_v32  ;;  %v2469_v8 = vmul.f32 -1.442695, %v2487_v13  ;;  %v4342_v11 = vadd.f32 %v4288_v33, %v1775_v46  ;;  %v2667_v33 = vld [vmem:[%s4473_s0] sm:$0xff]  ;;  %v2670_v32 = vld [vmem:[%s4473_s0 + $0x18] sm:$0xff] }
 0x763   :  { %v2616_v39 = vpop.eup %2615  ;;  %2635 = vrcp.f32 %v2265_v17  ;;  %v2268_v38 = vadd.f32 1.0, %v2614_v6  ;;  %v2471_v51 = vmul.f32 -1.442695, %v2503_v41  ;;  %vm2174_vm15 = vcmp.gt.f32.partialorder %v2476_v57, 0.0  ;;  %v2674_v46 = vld [vmem:[%s4473_s0 + $0x38] sm:$0xff] }
 0x764   :  { %v2618_v18 = vpop.eup %2617  ;;  %2637 = vrcp.f32 %v2266_v30  ;;  %v2267_v12 = vadd.f32 1.0, %v2616_v39  ;;  %v2190_v60 = vmul.f32 0.01, %v2476_v57  ;;  %vm2176_vm2 = vcmp.gt.f32.partialorder %v4336_v5, 0.0  ;;  %v2671_v30 = vld [vmem:[%s4473_s0 + $0x20] sm:$0xff] }
 0x765   :  { %v2620_v56 = vpop.eup %2619  ;;  %2639 = vrcp.f32 %v2268_v38  ;;  %v2269_v63 = vadd.f32 1.0, %v2618_v18  ;;  %v2478_v35 = vadd.f32 %v4290_v14, %v4346_v9  ;;  %v2192_v20 = vmul.f32 0.01, %v4336_v5 }
 0x766   :  { %v2622_v26 = vpop.eup %2621  ;;  %2641 = vrcp.f32 %v2267_v12  ;;  %v2270_v4 = vadd.f32 1.0, %v2620_v56  ;;  %vm2175_vm7 = vcmp.gt.f32.partialorder %v4339_v22, 0.0  ;;  %vm2177_vm10 = vcmp.gt.f32.partialorder %v4342_v11, 0.0  ;;  %v2672_v12 = vld [vmem:[%s4473_s0 + $0x30] sm:$0xff] }
 0x767   :  { %v2624_v52 = vpop.eup %2623  ;;  %2643 = vrcp.f32 %v2269_v63  ;;  %v2272_v61 = vadd.f32 1.0, %v2622_v26  ;;  %v2193_v0 = vmul.f32 0.01, %v4342_v11  ;;  %v2206_v18 = vsel %vm2174_vm15, %v2476_v57, %v2190_v60  ;;  %v2673_v26 = vld [vmem:[%s4473_s0 + $0x28] sm:$0xff] }
 0x768   :  { %v2626_v49 = vpop.eup %2625  ;;  %2645 = vrcp.f32 %v2270_v4  ;;  %v2271_v44 = vadd.f32 1.0, %v2624_v52  ;;  %v2194_v50 = vmul.f32 0.01, %v2478_v35  ;;  %v2208_v15 = vsel %vm2176_vm2, %v4336_v5, %v2192_v20 }
 0x769   :  { %v2628_v2 = vpop.eup %2627  ;;  %2647 = vrcp.f32 %v2272_v61  ;;  %v2273_v16 = vadd.f32 1.0, %v2626_v49  ;;  %vm2178_vm4 = vcmp.gt.f32.partialorder %v2478_v35, 0.0  ;;  %v2209_v49 = vsel %vm2177_vm10, %v4342_v11, %v2193_v0 }
 0x76a   :  { %v2630_v23 = vpop.eup %2629  ;;  %2649 = vrcp.f32 %v2271_v44  ;;  %v2274_v37 = vadd.f32 1.0, %v2628_v2  ;;  %v2210_v5 = vsel %vm2178_vm4, %v2478_v35, %v2194_v50  ;;  %v2495_v35 = vadd.f32 %v4296_v43, %v4346_v9 }
 0x76b   :  { %v2632_v47 = vpop.eup %2631  ;;  %v2310_v3 = vmul.f32 %v2630_v23, %v4308_v42  ;;  %2651 = vrcp.f32 %v2273_v16  ;;  %v2676_v16 = vld [vmem:[%s4473_s0 + $0x50] sm:$0xff] }
 0x76c   :  { %v2634_v19 = vpop.eup %2633  ;;  %v2312_v54 = vmul.f32 %v2632_v47, %v4311_v34  ;;  %2653 = vrcp.f32 %v2274_v37  ;;  %v2668_v34 = vld [vmem:[%s4473_s0 + $0x10] sm:$0xff]  ;;  %v2677_v37 = vld [vmem:[%s4473_s0 + $0x48] sm:$0xff]  ;;  %vm2181_vm9 = vcmp.gt.f32.partialorder %v2495_v35, 0.0 }
 0x76d   :  { %v2636_v31 = vpop.eup %2635  ;;  %v2326_v1 = vadd.f32 %v2667_v33, %v2310_v3  ;;  %v2311_v42 = vmul.f32 %v2634_v19, %v4314_v58  ;;  %2655 = vpow2.f32 %v2470_v53  ;;  %v2669_v58 = vld [vmem:[%s4473_s0 + $0x8] sm:$0xff]  ;;  %v2678_v3 = vld [vmem:[%s4473_s0 + $0x58] sm:$0xff] }
 0x76e   :  { %v2638_v45 = vpop.eup %2637  ;;  %v2328_v59 = vadd.f32 %v2668_v34, %v2312_v54  ;;  %v2313_v62 = vmul.f32 %v2636_v31, %v4317_v24  ;;  %2657 = vpow2.f32 %v2469_v8  ;;  %v2191_v24 = vmul.f32 0.01, %v4339_v22  ;;  %v2679_v54 = vld [vmem:[%s4473_s0 + $0x60] sm:$0xff] }
 0x76f   :  { %v2640_v21 = vpop.eup %2639  ;;  %2342 = vst [vmem:[%s4481_s8] sm:$0xff] %v2326_v1  ;;  %v2327_v14 = vadd.f32 %v2669_v58, %v2311_v42  ;;  %v2314_v7 = vmul.f32 %v2638_v45, %v2202_v29  ;;  %2659 = vpow2.f32 %v2471_v51  ;;  %v2494_v42 = vadd.f32 %v4292_v36, %v4346_v9 }
 0x770   :  { %v2642_v10 = vpop.eup %2641  ;;  %2344 = vst [vmem:[%s4481_s8 + $0x10] sm:$0xff] %v2328_v59  ;;  %v2329_v55 = vadd.f32 %v2670_v32, %v2313_v62  ;;  %v2316_v17 = vmul.f32 %v2640_v21, %v2204_v28  ;;  %v2207_v52 = vsel %vm2175_vm7, %v4339_v22, %v2191_v24  ;;  %v2479_v45 = vadd.f32 %v4294_v48, %v4346_v9  ;;  %v2680_v48 = vld [vmem:[%s4473_s0 + $0x70] sm:$0xff]  ;;  %v2681_v9 = vld [vmem:[%s4473_s0 + $0x68] sm:$0xff] }
 0x771   :  { %v2644_v6 = vpop.eup %2643  ;;  %2343 = vst [vmem:[%s4481_s8 + $0x8] sm:$0xff] %v2327_v14  ;;  %v2330_v39 = vadd.f32 %v2671_v30, %v2314_v7  ;;  %v2315_v25 = vmul.f32 %v2642_v10, %v4327_v40  ;;  %v2196_v34 = vmul.f32 0.01, %v2494_v42  ;;  %vm2180_vm0 = vcmp.gt.f32.partialorder %v2494_v42, 0.0 }
 0x772   :  { %v2646_v38 = vpop.eup %2645  ;;  %2345 = vst [vmem:[%s4481_s8 + $0x18] sm:$0xff] %v2329_v55  ;;  %v2332_v56 = vadd.f32 %v2672_v12, %v2316_v17  ;;  %v2317_v29 = vmul.f32 %v2644_v6, %v4332_v27  ;;  %v2675_v27 = vld [vmem:[%s4473_s0 + $0x40] sm:$0xff]  ;;  %v2195_v59 = vmul.f32 0.01, %v2479_v45  ;;  %vm2179_vm3 = vcmp.gt.f32.partialorder %v2479_v45, 0.0  ;;  %v2682_v17 = vld [vmem:[%s4473_s0 + $0x78] sm:$0xff] }
 0x773   :  { %v2648_v63 = vpop.eup %2647  ;;  %2346 = vst [vmem:[%s4481_s8 + $0x20] sm:$0xff] %v2330_v39  ;;  %v2331_v28 = vadd.f32 %v2673_v26, %v2315_v25  ;;  %v2318_v4 = vmul.f32 %v2646_v38, %v2206_v18  ;;  %v2197_v62 = vmul.f32 0.01, %v2495_v35  ;;  %v2212_v20 = vsel %vm2180_vm0, %v2494_v42, %v2196_v34 }
 0x774   :  { %v2650_v13 = vpop.eup %2649  ;;  %2348 = vst [vmem:[%s4481_s8 + $0x30] sm:$0xff] %v2332_v56  ;;  %v2333_v40 = vadd.f32 %v2674_v46, %v2317_v29  ;;  %v2320_v61 = vmul.f32 %v2648_v63, %v2208_v15  ;;  %v2211_v14 = vsel %vm2179_vm3, %v2479_v45, %v2195_v59 }
 0x775   :  { %v2652_v41 = vpop.eup %2651  ;;  %2347 = vst [vmem:[%s4481_s8 + $0x28] sm:$0xff] %v2331_v28  ;;  %v2334_v57 = vadd.f32 %v2675_v27, %v2318_v4  ;;  %v2319_v44 = vmul.f32 %v2650_v13, %v2207_v52  ;;  %v2213_v36 = vsel %vm2181_vm9, %v2495_v35, %v2197_v62 }
 0x776   :  { %v2654_v2 = vpop.eup %2653  ;;  %2349 = vst [vmem:[%s4481_s8 + $0x38] sm:$0xff] %v2333_v40  ;;  %v2336_v53 = vadd.f32 %v2676_v16, %v2320_v61  ;;  %v2321_v23 = vmul.f32 %v2652_v41, %v2209_v49 }
 0x777   :  { %v2656_v22 = vpop.eup %2655  ;;  %2350 = vst [vmem:[%s4481_s8 + $0x40] sm:$0xff] %v2334_v57  ;;  %v2335_v8 = vadd.f32 %v2677_v37, %v2319_v44  ;;  %v2322_v47 = vmul.f32 %v2654_v2, %v2210_v5 }
 0x778   :  { %v2658_v11 = vpop.eup %2657  ;;  %2352 = vst [vmem:[%s4481_s8 + $0x50] sm:$0xff] %v2336_v53  ;;  %v2337_v51 = vadd.f32 %v2678_v3, %v2321_v23  ;;  %v2276_v19 = vadd.f32 1.0, %v2656_v22 }
 0x779   :  { %v2660_v60 = vpop.eup %2659  ;;  %2351 = vst [vmem:[%s4481_s8 + $0x48] sm:$0xff] %v2335_v8  ;;  %v2338_v31 = vadd.f32 %v2679_v54, %v2322_v47  ;;  %v2275_v33 = vadd.f32 1.0, %v2658_v11 }
 0x77a   :  { %2353 = vst [vmem:[%s4481_s8 + $0x58] sm:$0xff] %v2337_v51  ;;  %2661 = vrcp.f32 %v2276_v19  ;;  %v2277_v1 = vadd.f32 1.0, %v2660_v60 }
 0x77b   :  { %2354 = vst [vmem:[%s4481_s8 + $0x60] sm:$0xff] %v2338_v31  ;;  %2663 = vrcp.f32 %v2275_v33 }
 0x77c   :  { %2665 = vrcp.f32 %v2277_v1 }
 0x784   :  { %v2662_v21 = vpop.eup %2661 }
 0x785   :  { %v2664_v58 = vpop.eup %2663  ;;  %v2324_v7 = vmul.f32 %v2662_v21, %v2212_v20 }
 0x786   :  { %v2666_v10 = vpop.eup %2665  ;;  %v2323_v24 = vmul.f32 %v2664_v58, %v2211_v14 }
 0x787   :  { %v2340_v32 = vadd.f32 %v2680_v48, %v2324_v7  ;;  %v2325_v43 = vmul.f32 %v2666_v10, %v2213_v36 }
 0x788   :  { %v2339_v55 = vadd.f32 %v2681_v9, %v2323_v24 }
 0x789   :  { %2356 = vst [vmem:[%s4481_s8 + $0x70] sm:$0xff] %v2340_v32  ;;  %v2341_v6 = vadd.f32 %v2682_v17, %v2325_v43 }
 0x78a   :  { %2355 = vst [vmem:[%s4481_s8 + $0x68] sm:$0xff] %v2339_v55 }
 0x78b   :  { %2357 = vst [vmem:[%s4481_s8 + $0x78] sm:$0xff] %v2341_v6 }

</bundles_post_ra>
